<compile_context>
chip_gen: v6e
topology: v6e:2x2x1
jax: 0.10.0
libtpu: 0.0.40
codegen_flags: <defaults>
</compile_context>

<pallas_src>
import jax
import jax.numpy as jnp
from jax.experimental import pallas as pl
from jax.experimental.pallas import tpu as pltpu

INPUT_SIZE = 768      # finbert hidden size (LSTM input_size)
HIDDEN = 128          # LSTM hidden_size
NUM_CLASSES = 3       # fc output
LANE = 128            # lane-dense fc output width
VOCAB = 64            # synthetic embedding table size


def _round_up(x, m):
    return ((x + m - 1) // m) * m


def _make_kernel(T, Bb, S, needs_mask):
    """Build the fused LSTM+fc kernel for static chunk length T, batch tile Bb."""

    def kernel(x_ref, w_ih_ref, w_hh_ref, b_ref, scores_ref,
               w_fc_h_ref, w_fc_s_ref, b_fc_ref, out_ref,
               gates_ref, h_ref, c_ref):
        # x_ref:      (T*Bb, 768) bf16  time-major chunk, rows [t*Bb:(t+1)*Bb] = step t
        # w_ih_ref:   (768, 512)  bf16  input->gates  (pre-transposed, order i,f,o,g)
        # w_hh_ref:   (128, 512)  bf16  hidden->gates (pre-transposed, order i,f,o,g)
        # b_ref:      (1, 512)    f32   b_ih + b_hh   (order i,f,o,g)
        # scores_ref: (Bb, 1)     f32   sentiment score feature
        # w_fc_*_ref: lane-dense fc weights (128,128)/(1,128)/(1,128) f32
        # out_ref:    (Bb, 128)   f32   logits (cols >=3 are padding)
        # gates_ref:  (T*Bb, 512) f32   staged input projection (VMEM scratch)
        # h_ref/c_ref:(Bb, 128)   bf16/f32 persistent LSTM state scratch
        s = pl.program_id(1)

        @pl.when(s == 0)
        def _init():
            h_ref[...] = jnp.zeros_like(h_ref)
            c_ref[...] = jnp.zeros_like(c_ref)

        # Hoisted input projection: one big bf16 MXU GEMM for the whole chunk,
        # bias folded in once, result staged through explicit VMEM scratch so
        # the (T*Bb, 512) intermediate never lives across the serial loop.
        gates_ref[...] = (jnp.dot(x_ref[...], w_ih_ref[...],
                                  preferred_element_type=jnp.float32)
                          + b_ref[...])

        w_hh = w_hh_ref[...]
        h = h_ref[...]          # bf16 carry (feeds MXU directly)
        c = c_ref[...]          # f32 carry
        # Statically unrolled recurrence: only the small recurrent matmul and
        # the elementwise gate math remain on the serial critical path.
        for t in range(T):
            g_t = gates_ref[pl.ds(t * Bb, Bb), :]
            gates = g_t + jnp.dot(h, w_hh, preferred_element_type=jnp.float32)
            ifo = jax.nn.sigmoid(gates[:, :3 * HIDDEN])   # one contiguous EUP slab
            i = ifo[:, 0 * HIDDEN:1 * HIDDEN]
            f = ifo[:, 1 * HIDDEN:2 * HIDDEN]
            o = ifo[:, 2 * HIDDEN:3 * HIDDEN]
            g = jnp.tanh(gates[:, 3 * HIDDEN:4 * HIDDEN])
            c_new = f * c + i * g
            h_new = (o * jnp.tanh(c_new)).astype(jnp.bfloat16)
            if needs_mask:
                # Tail timesteps beyond the true sequence length must NOT
                # update the state (zero inputs would still move h/c).
                valid = (s * T + t) < S
                c = jnp.where(valid, c_new, c)
                h = jnp.where(valid, h_new, h)
            else:
                c = c_new
                h = h_new
        h_ref[...] = h
        c_ref[...] = c

        @pl.when(s == pl.num_programs(1) - 1)
        def _finalize():
            hl = h_ref[...].astype(jnp.float32)
            # fc(cat([h_last, scores], 1)) == h_last @ W_h + scores @ W_s + b
            out_ref[...] = (jnp.dot(hl, w_fc_h_ref[...],
                                    preferred_element_type=jnp.float32)
                            + scores_ref[...] * w_fc_s_ref[...]
                            + b_fc_ref[...])

    return kernel


def init_params(key):
    ks = jax.random.split(key, 7)
    scale = 0.05
    emb = scale * jax.random.normal(ks[0], (VOCAB, INPUT_SIZE), jnp.float32)
    # PyTorch LSTM params: weight_ih_l0 (4H,768), weight_hh_l0 (4H,128),
    # bias_ih_l0 (4H,), bias_hh_l0 (4H,). Canonical gate order i, f, g, o.
    w_ih = scale * jax.random.normal(ks[1], (4 * HIDDEN, INPUT_SIZE), jnp.float32)
    w_hh = scale * jax.random.normal(ks[2], (4 * HIDDEN, HIDDEN), jnp.float32)
    b_ih = scale * jax.random.normal(ks[3], (4 * HIDDEN,), jnp.float32)
    b_hh = scale * jax.random.normal(ks[4], (4 * HIDDEN,), jnp.float32)
    # fc: Linear(128 + 1, 3) -> weight (3, 129), bias (3,)
    w_fc = scale * jax.random.normal(ks[5], (NUM_CLASSES, HIDDEN + 1), jnp.float32)
    b_fc = scale * jax.random.normal(ks[6], (NUM_CLASSES,), jnp.float32)
    return {
        "emb": emb,
        "w_ih_t": w_ih.T,                      # (768, 512) gate order i,f,g,o
        "w_hh_t": w_hh.T,                      # (128, 512)
        "b": (b_ih + b_hh)[None, :],           # (1, 512)
        "w_fc_h": w_fc[:, :HIDDEN].T,          # (128, 3)
        "w_fc_s": w_fc[:, HIDDEN:].T,          # (1, 3)
        "b_fc": b_fc[None, :],                 # (1, 3)
    }


def _permute_gates_ifog_to_ifog_last(w):
    """Reorder 4H gate columns from [i,f,g,o] to [i,f,o,g] (sigmoids contiguous)."""
    H = HIDDEN
    return jnp.concatenate(
        [w[..., :2 * H], w[..., 3 * H:4 * H], w[..., 2 * H:3 * H]], axis=-1)


def finbert_lstm_forward(input_ids, attention_mask, scores, params,
                         *, unroll_cap=64, rows_target=1024):
    B, S = input_ids.shape

    # Batch padding / tiling (sublane multiple; tile <=64 so v7x can split it).
    Bp = max(8, _round_up(B, 8))
    Bb = min(Bp, 64)
    Bp = _round_up(Bp, Bb)
    nB = Bp // Bb

    # Sequence chunking: aim for ~rows_target GEMM rows per chunk, independent
    # of S divisibility; keep the static unroll bounded.  VMEM use stays small
    # (<~6 MiB) so it fits every generation's scoped default.
    T = max(1, min(S, max(1, rows_target // Bb), unroll_cap))
    nS = (S + T - 1) // T
    Spad = nS * T
    needs_mask = (Spad != S)

    # --- glue: synthetic FinBERT last_hidden_state, gathered time-major ---
    x = params["emb"][input_ids.T]                                   # (S, B, 768)
    x = x * attention_mask.T[..., None].astype(x.dtype)
    x = x.astype(jnp.bfloat16)                                       # bf16 MXU input
    if Bp != B:
        x = jnp.pad(x, ((0, 0), (0, Bp - B), (0, 0)))
    if Spad != S:
        x = jnp.pad(x, ((0, Spad - S), (0, 0), (0, 0)))              # masked in-kernel
    # (Spad, Bp, 768) -> (nB, Spad*Bb, 768): contiguous time-major slab per batch block
    x = x.reshape(Spad, nB, Bb, INPUT_SIZE).transpose(1, 0, 2, 3)
    x = x.reshape(nB, Spad * Bb, INPUT_SIZE)

    scores_p = jnp.zeros((Bp, 1), jnp.float32).at[:B, 0].set(
        scores.astype(jnp.float32))

    # Gate-permuted, bf16 LSTM weights.
    w_ih_bf = _permute_gates_ifog_to_ifog_last(params["w_ih_t"]).astype(jnp.bfloat16)
    w_hh_bf = _permute_gates_ifog_to_ifog_last(params["w_hh_t"]).astype(jnp.bfloat16)
    b_p = _permute_gates_ifog_to_ifog_last(params["b"])

    # Lane-dense fc head (pad N: 3 -> 128 with zeros).
    w_fc_h = jnp.zeros((HIDDEN, LANE), jnp.float32).at[:, :NUM_CLASSES].set(
        params["w_fc_h"])
    w_fc_s = jnp.zeros((1, LANE), jnp.float32).at[:, :NUM_CLASSES].set(
        params["w_fc_s"])
    b_fc = jnp.zeros((1, LANE), jnp.float32).at[:, :NUM_CLASSES].set(
        params["b_fc"])

    kernel = _make_kernel(T, Bb, S, needs_mask)

    out = pl.pallas_call(
        kernel,
        out_shape=jax.ShapeDtypeStruct((Bp, LANE), jnp.float32),
        grid=(nB, nS),
        in_specs=[
            pl.BlockSpec((None, T * Bb, INPUT_SIZE), lambda bi, si: (bi, si, 0)),  # x chunk
            pl.BlockSpec((INPUT_SIZE, 4 * HIDDEN), lambda bi, si: (0, 0)),         # w_ih
            pl.BlockSpec((HIDDEN, 4 * HIDDEN), lambda bi, si: (0, 0)),             # w_hh
            pl.BlockSpec((1, 4 * HIDDEN), lambda bi, si: (0, 0)),                  # bias
            pl.BlockSpec((Bb, 1), lambda bi, si: (bi, 0)),                         # scores
            pl.BlockSpec((HIDDEN, LANE), lambda bi, si: (0, 0)),                   # w_fc_h
            pl.BlockSpec((1, LANE), lambda bi, si: (0, 0)),                        # w_fc_s
            pl.BlockSpec((1, LANE), lambda bi, si: (0, 0)),                        # b_fc
        ],
        out_specs=pl.BlockSpec((Bb, LANE), lambda bi, si: (bi, 0)),
        scratch_shapes=[
            pltpu.VMEM((T * Bb, 4 * HIDDEN), jnp.float32),   # staged gates (input proj)
            pltpu.VMEM((Bb, HIDDEN), jnp.bfloat16),          # h (bf16 carry)
            pltpu.VMEM((Bb, HIDDEN), jnp.float32),           # c
        ],
        compiler_params=pltpu.CompilerParams(
            dimension_semantics=("parallel", "arbitrary")),
    )(x, w_ih_bf, w_hh_bf, b_p, scores_p, w_fc_h, w_fc_s, b_fc)

    return out[:B, :NUM_CLASSES]


def reference_forward(input_ids, attention_mask, scores, params):
    """Pure f32 JAX reference of the module's forward (canonical i,f,g,o order)."""
    emb = params["emb"][input_ids] * attention_mask[..., None].astype(jnp.float32)
    B, S, _ = emb.shape
    h = jnp.zeros((B, HIDDEN), jnp.float32)
    c = jnp.zeros((B, HIDDEN), jnp.float32)
    for t in range(S):
        gates = emb[:, t] @ params["w_ih_t"] + h @ params["w_hh_t"] + params["b"]
        i = jax.nn.sigmoid(gates[:, 0 * HIDDEN:1 * HIDDEN])
        f = jax.nn.sigmoid(gates[:, 1 * HIDDEN:2 * HIDDEN])
        g = jnp.tanh(gates[:, 2 * HIDDEN:3 * HIDDEN])
        o = jax.nn.sigmoid(gates[:, 3 * HIDDEN:4 * HIDDEN])
        c = f * c + i * g
        h = o * jnp.tanh(c)
    combined = jnp.concatenate([h, scores[:, None]], axis=1)         # (B, 129)
    w_full = jnp.concatenate([params["w_fc_h"], params["w_fc_s"]], axis=0)
    return combined @ w_full + params["b_fc"]


if __name__ == "__main__":
    key = jax.random.PRNGKey(0)
    k_param, k_ids, k_scores, k_ids2, k_scores2 = jax.random.split(key, 5)
    params = init_params(k_param)

    # --- main check: small shapes from the module spec (B=2, S=8) ---
    B, S = 2, 8
    input_ids = jax.random.randint(k_ids, (B, S), 0, VOCAB, dtype=jnp.int32)
    attention_mask = jnp.ones((B, S), dtype=jnp.int32).at[:, -2:].set(0)
    scores = jax.random.uniform(k_scores, (B,), jnp.float32, -1.0, 1.0)

    logits = finbert_lstm_forward(input_ids, attention_mask, scores, params)
    logits = jax.block_until_ready(logits)
    ref = reference_forward(input_ids, attention_mask, scores, params)
    assert logits.shape == (B, NUM_CLASSES)
    # bf16 matmuls + bf16 h carry inside the kernel -> loosened tolerance vs f32 ref
    assert jnp.allclose(logits, ref, atol=1e-2, rtol=1e-2), (logits, ref)

    # --- second check: non-divisible S exercises multi-chunk grid + tail mask ---
    B2, S2 = 3, 10
    input_ids2 = jax.random.randint(k_ids2, (B2, S2), 0, VOCAB, dtype=jnp.int32)
    attention_mask2 = jnp.ones((B2, S2), dtype=jnp.int32).at[:, -1:].set(0)
    scores2 = jax.random.uniform(k_scores2, (B2,), jnp.float32, -1.0, 1.0)
    logits2 = finbert_lstm_forward(input_ids2, attention_mask2, scores2, params,
                                   unroll_cap=4)   # force T=4, nS=3, masked tail
    logits2 = jax.block_until_ready(logits2)
    ref2 = reference_forward(input_ids2, attention_mask2, scores2, params)
    assert jnp.allclose(logits2, ref2, atol=1e-2, rtol=1e-2), (logits2, ref2)

    print("KERNEL_OK")
</pallas_src>

<mosaic_0001>
module attributes {stable_mosaic.version = 11 : i64} {
  func.func @kernel(%arg0: i32, %arg1: i32, %arg2: memref<1x64x768xbf16, #tpu.memory_space<vmem>>, %arg3: memref<768x512xbf16, #tpu.memory_space<vmem>>, %arg4: memref<128x512xbf16, #tpu.memory_space<vmem>>, %arg5: memref<1x512xf32, #tpu.memory_space<vmem>>, %arg6: memref<8x1xf32, #tpu.memory_space<vmem>>, %arg7: memref<128x128xf32, #tpu.memory_space<vmem>>, %arg8: memref<1x128xf32, #tpu.memory_space<vmem>>, %arg9: memref<1x128xf32, #tpu.memory_space<vmem>>, %arg10: memref<8x128xf32, #tpu.memory_space<vmem>>, %arg11: memref<64x512xf32, #tpu.memory_space<vmem>>, %arg12: memref<8x128xbf16, #tpu.memory_space<vmem>>, %arg13: memref<8x128xf32, #tpu.memory_space<vmem>>) attributes {dimension_semantics = [#tpu.dimension_semantics<parallel>, #tpu.dimension_semantics<arbitrary>], iteration_bounds = array<i64: 1, 1>, scalar_prefetch = 0 : i64, scratch_operands = 3 : i64, tpu.core_type = #tpu.core_type<tc>, window_params = [{transform_indices = @transform_0, window_bounds = array<i64: 1, 64, 768>}, {pipeline_mode = #tpu.pipeline_mode<synchronous>, transform_indices = @transform_1, window_bounds = array<i64: 768, 512>}, {pipeline_mode = #tpu.pipeline_mode<synchronous>, transform_indices = @transform_2, window_bounds = array<i64: 128, 512>}, {pipeline_mode = #tpu.pipeline_mode<synchronous>, transform_indices = @transform_3, window_bounds = array<i64: 1, 512>}, {transform_indices = @transform_4, window_bounds = array<i64: 8, 1>}, {pipeline_mode = #tpu.pipeline_mode<synchronous>, transform_indices = @transform_5, window_bounds = array<i64: 128, 128>}, {pipeline_mode = #tpu.pipeline_mode<synchronous>, transform_indices = @transform_6, window_bounds = array<i64: 1, 128>}, {pipeline_mode = #tpu.pipeline_mode<synchronous>, transform_indices = @transform_7, window_bounds = array<i64: 1, 128>}, {transform_indices = @transform_8, window_bounds = array<i64: 8, 128>}]} {
    %c0_i32 = arith.constant 0 : i32
    %0 = arith.cmpi eq, %arg1, %c0_i32 : i32
    %1 = arith.extui %0 : i1 to i32
    %c0_i32_0 = arith.constant 0 : i32
    %2 = arith.cmpi ne, %1, %c0_i32_0 : i32
    scf.if %2 {
      %cst_46 = arith.constant 0.000000e+00 : bf16
      %179 = vector.broadcast %cst_46 : bf16 to vector<8x128xbf16>
      %c0_47 = arith.constant 0 : index
      %c0_48 = arith.constant 0 : index
      %180 = vector.load %arg12[%c0_47, %c0_48] : memref<8x128xbf16, #tpu.memory_space<vmem>>, vector<8x128xbf16>
      tpu.vector_store %arg12[%c0_47, %c0_48], %179 {strides = array<i32>} : memref<8x128xbf16, #tpu.memory_space<vmem>>, vector<8x128xbf16>,
      %cst_49 = arith.constant 0.000000e+00 : f32
      %181 = vector.broadcast %cst_49 : f32 to vector<8x128xf32>
      %c0_50 = arith.constant 0 : index
      %c0_51 = arith.constant 0 : index
      %182 = vector.load %arg13[%c0_50, %c0_51] : memref<8x128xf32, #tpu.memory_space<vmem>>, vector<8x128xf32>
      tpu.vector_store %arg13[%c0_50, %c0_51], %181 {strides = array<i32>} : memref<8x128xf32, #tpu.memory_space<vmem>>, vector<8x128xf32>,
    } else {
    }
    %c0 = arith.constant 0 : index
    %c0_1 = arith.constant 0 : index
    %c0_2 = arith.constant 0 : index
    %3 = vector.load %arg2[%c0, %c0_1, %c0_2] : memref<1x64x768xbf16, #tpu.memory_space<vmem>>, vector<1x64x768xbf16>
    %4 = vector.shape_cast %3 : vector<1x64x768xbf16> to vector<64x768xbf16>
    %c0_3 = arith.constant 0 : index
    %c0_4 = arith.constant 0 : index
    %5 = vector.load %arg3[%c0_3, %c0_4] : memref<768x512xbf16, #tpu.memory_space<vmem>>, vector<768x512xbf16>
    %cst = arith.constant dense<0.000000e+00> : vector<64x512xf32>
    %6 = tpu.matmul %4, %5, %cst {dimension_numbers = #tpu.dot_dimension_numbers<[1], [0], [0], [1], [0, 0, 1, 1], [], []>} : vector<64x768xbf16>, vector<768x512xbf16>, vector<64x512xf32> -> vector<64x512xf32>
    %c0_5 = arith.constant 0 : index
    %c0_6 = arith.constant 0 : index
    %7 = vector.load %arg5[%c0_5, %c0_6] : memref<1x512xf32, #tpu.memory_space<vmem>>, vector<1x512xf32>
    %8 = vector.broadcast %7 : vector<1x512xf32> to vector<64x512xf32>
    %9 = arith.addf %6, %8 : vector<64x512xf32>
    %c0_7 = arith.constant 0 : index
    %c0_8 = arith.constant 0 : index
    %10 = vector.load %arg11[%c0_7, %c0_8] : memref<64x512xf32, #tpu.memory_space<vmem>>, vector<64x512xf32>
    tpu.vector_store %arg11[%c0_7, %c0_8], %9 {strides = array<i32>} : memref<64x512xf32, #tpu.memory_space<vmem>>, vector<64x512xf32>,
    %c0_9 = arith.constant 0 : index
    %c0_10 = arith.constant 0 : index
    %11 = vector.load %arg4[%c0_9, %c0_10] : memref<128x512xbf16, #tpu.memory_space<vmem>>, vector<128x512xbf16>
    %c0_11 = arith.constant 0 : index
    %c0_12 = arith.constant 0 : index
    %12 = vector.load %arg12[%c0_11, %c0_12] : memref<8x128xbf16, #tpu.memory_space<vmem>>, vector<8x128xbf16>
    %c0_13 = arith.constant 0 : index
    %c0_14 = arith.constant 0 : index
    %13 = vector.load %arg13[%c0_13, %c0_14] : memref<8x128xf32, #tpu.memory_space<vmem>>, vector<8x128xf32>
    %c0_15 = arith.constant 0 : index
    %c0_16 = arith.constant 0 : index
    %14 = vector.load %arg11[%c0_15, %c0_16] : memref<64x512xf32, #tpu.memory_space<vmem>>, vector<8x512xf32>
    %cst_17 = arith.constant dense<0.000000e+00> : vector<8x512xf32>
    %15 = tpu.matmul %12, %11, %cst_17 {dimension_numbers = #tpu.dot_dimension_numbers<[1], [0], [0], [1], [0, 0, 1, 1], [], []>} : vector<8x128xbf16>, vector<128x512xbf16>, vector<8x512xf32> -> vector<8x512xf32>
    %16 = arith.addf %14, %15 : vector<8x512xf32>
    %17 = vector.extract_strided_slice %16 {offsets = [0, 0], sizes = [8, 384], strides = [1, 1]} : vector<8x512xf32> to vector<8x384xf32>
    %18 = arith.negf %17 : vector<8x384xf32>
    %19 = math.exp %18 : vector<8x384xf32>
    %cst_18 = arith.constant 1.000000e+00 : f32
    %20 = vector.broadcast %cst_18 : f32 to vector<8x384xf32>
    %21 = arith.addf %20, %19 : vector<8x384xf32>
    %22 = arith.divf %20, %21 : vector<8x384xf32>
    %23 = vector.extract_strided_slice %22 {offsets = [0, 0], sizes = [8, 128], strides = [1, 1]} : vector<8x384xf32> to vector<8x128xf32>
    %24 = vector.extract_strided_slice %22 {offsets = [0, 128], sizes = [8, 128], strides = [1, 1]} : vector<8x384xf32> to vector<8x128xf32>
    %25 = vector.extract_strided_slice %22 {offsets = [0, 256], sizes = [8, 128], strides = [1, 1]} : vector<8x384xf32> to vector<8x128xf32>
    %26 = vector.extract_strided_slice %16 {offsets = [0, 384], sizes = [8, 128], strides = [1, 1]} : vector<8x512xf32> to vector<8x128xf32>
    %27 = math.tanh %26 : vector<8x128xf32>
    %28 = arith.mulf %24, %13 : vector<8x128xf32>
    %29 = arith.mulf %23, %27 : vector<8x128xf32>
    %30 = arith.addf %28, %29 : vector<8x128xf32>
    %31 = math.tanh %30 : vector<8x128xf32>
    %32 = arith.mulf %25, %31 : vector<8x128xf32>
    %33 = arith.truncf %32 : vector<8x128xf32> to vector<8x128xbf16>
    %c8 = arith.constant 8 : index
    %c0_19 = arith.constant 0 : index
    %34 = vector.load %arg11[%c8, %c0_19] : memref<64x512xf32, #tpu.memory_space<vmem>>, vector<8x512xf32>
    %cst_20 = arith.constant dense<0.000000e+00> : vector<8x512xf32>
    %35 = tpu.matmul %33, %11, %cst_20 {dimension_numbers = #tpu.dot_dimension_numbers<[1], [0], [0], [1], [0, 0, 1, 1], [], []>} : vector<8x128xbf16>, vector<128x512xbf16>, vector<8x512xf32> -> vector<8x512xf32>
    %36 = arith.addf %34, %35 : vector<8x512xf32>
    %37 = vector.extract_strided_slice %36 {offsets = [0, 0], sizes = [8, 384], strides = [1, 1]} : vector<8x512xf32> to vector<8x384xf32>
    %38 = arith.negf %37 : vector<8x384xf32>
    %39 = math.exp %38 : vector<8x384xf32>
    %cst_21 = arith.constant 1.000000e+00 : f32
    %40 = vector.broadcast %cst_21 : f32 to vector<8x384xf32>
    %41 = arith.addf %40, %39 : vector<8x384xf32>
    %42 = arith.divf %40, %41 : vector<8x384xf32>
    %43 = vector.extract_strided_slice %42 {offsets = [0, 0], sizes = [8, 128], strides = [1, 1]} : vector<8x384xf32> to vector<8x128xf32>
    %44 = vector.extract_strided_slice %42 {offsets = [0, 128], sizes = [8, 128], strides = [1, 1]} : vector<8x384xf32> to vector<8x128xf32>
    %45 = vector.extract_strided_slice %42 {offsets = [0, 256], sizes = [8, 128], strides = [1, 1]} : vector<8x384xf32> to vector<8x128xf32>
    %46 = vector.extract_strided_slice %36 {offsets = [0, 384], sizes = [8, 128], strides = [1, 1]} : vector<8x512xf32> to vector<8x128xf32>
    %47 = math.tanh %46 : vector<8x128xf32>
    %48 = arith.mulf %44, %30 : vector<8x128xf32>
    %49 = arith.mulf %43, %47 : vector<8x128xf32>
    %50 = arith.addf %48, %49 : vector<8x128xf32>
    %51 = math.tanh %50 : vector<8x128xf32>
    %52 = arith.mulf %45, %51 : vector<8x128xf32>
    %53 = arith.truncf %52 : vector<8x128xf32> to vector<8x128xbf16>
    %c16 = arith.constant 16 : index
    %c0_22 = arith.constant 0 : index
    %54 = vector.load %arg11[%c16, %c0_22] : memref<64x512xf32, #tpu.memory_space<vmem>>, vector<8x512xf32>
    %cst_23 = arith.constant dense<0.000000e+00> : vector<8x512xf32>
    %55 = tpu.matmul %53, %11, %cst_23 {dimension_numbers = #tpu.dot_dimension_numbers<[1], [0], [0], [1], [0, 0, 1, 1], [], []>} : vector<8x128xbf16>, vector<128x512xbf16>, vector<8x512xf32> -> vector<8x512xf32>
    %56 = arith.addf %54, %55 : vector<8x512xf32>
    %57 = vector.extract_strided_slice %56 {offsets = [0, 0], sizes = [8, 384], strides = [1, 1]} : vector<8x512xf32> to vector<8x384xf32>
    %58 = arith.negf %57 : vector<8x384xf32>
    %59 = math.exp %58 : vector<8x384xf32>
    %cst_24 = arith.constant 1.000000e+00 : f32
    %60 = vector.broadcast %cst_24 : f32 to vector<8x384xf32>
    %61 = arith.addf %60, %59 : vector<8x384xf32>
    %62 = arith.divf %60, %61 : vector<8x384xf32>
    %63 = vector.extract_strided_slice %62 {offsets = [0, 0], sizes = [8, 128], strides = [1, 1]} : vector<8x384xf32> to vector<8x128xf32>
    %64 = vector.extract_strided_slice %62 {offsets = [0, 128], sizes = [8, 128], strides = [1, 1]} : vector<8x384xf32> to vector<8x128xf32>
    %65 = vector.extract_strided_slice %62 {offsets = [0, 256], sizes = [8, 128], strides = [1, 1]} : vector<8x384xf32> to vector<8x128xf32>
    %66 = vector.extract_strided_slice %56 {offsets = [0, 384], sizes = [8, 128], strides = [1, 1]} : vector<8x512xf32> to vector<8x128xf32>
    %67 = math.tanh %66 : vector<8x128xf32>
    %68 = arith.mulf %64, %50 : vector<8x128xf32>
    %69 = arith.mulf %63, %67 : vector<8x128xf32>
    %70 = arith.addf %68, %69 : vector<8x128xf32>
    %71 = math.tanh %70 : vector<8x128xf32>
    %72 = arith.mulf %65, %71 : vector<8x128xf32>
    %73 = arith.truncf %72 : vector<8x128xf32> to vector<8x128xbf16>
    %c24 = arith.constant 24 : index
    %c0_25 = arith.constant 0 : index
    %74 = vector.load %arg11[%c24, %c0_25] : memref<64x512xf32, #tpu.memory_space<vmem>>, vector<8x512xf32>
    %cst_26 = arith.constant dense<0.000000e+00> : vector<8x512xf32>
    %75 = tpu.matmul %73, %11, %cst_26 {dimension_numbers = #tpu.dot_dimension_numbers<[1], [0], [0], [1], [0, 0, 1, 1], [], []>} : vector<8x128xbf16>, vector<128x512xbf16>, vector<8x512xf32> -> vector<8x512xf32>
    %76 = arith.addf %74, %75 : vector<8x512xf32>
    %77 = vector.extract_strided_slice %76 {offsets = [0, 0], sizes = [8, 384], strides = [1, 1]} : vector<8x512xf32> to vector<8x384xf32>
    %78 = arith.negf %77 : vector<8x384xf32>
    %79 = math.exp %78 : vector<8x384xf32>
    %cst_27 = arith.constant 1.000000e+00 : f32
    %80 = vector.broadcast %cst_27 : f32 to vector<8x384xf32>
    %81 = arith.addf %80, %79 : vector<8x384xf32>
    %82 = arith.divf %80, %81 : vector<8x384xf32>
    %83 = vector.extract_strided_slice %82 {offsets = [0, 0], sizes = [8, 128], strides = [1, 1]} : vector<8x384xf32> to vector<8x128xf32>
    %84 = vector.extract_strided_slice %82 {offsets = [0, 128], sizes = [8, 128], strides = [1, 1]} : vector<8x384xf32> to vector<8x128xf32>
    %85 = vector.extract_strided_slice %82 {offsets = [0, 256], sizes = [8, 128], strides = [1, 1]} : vector<8x384xf32> to vector<8x128xf32>
    %86 = vector.extract_strided_slice %76 {offsets = [0, 384], sizes = [8, 128], strides = [1, 1]} : vector<8x512xf32> to vector<8x128xf32>
    %87 = math.tanh %86 : vector<8x128xf32>
    %88 = arith.mulf %84, %70 : vector<8x128xf32>
    %89 = arith.mulf %83, %87 : vector<8x128xf32>
    %90 = arith.addf %88, %89 : vector<8x128xf32>
    %91 = math.tanh %90 : vector<8x128xf32>
    %92 = arith.mulf %85, %91 : vector<8x128xf32>
    %93 = arith.truncf %92 : vector<8x128xf32> to vector<8x128xbf16>
    %c32 = arith.constant 32 : index
    %c0_28 = arith.constant 0 : index
    %94 = vector.load %arg11[%c32, %c0_28] : memref<64x512xf32, #tpu.memory_space<vmem>>, vector<8x512xf32>
    %cst_29 = arith.constant dense<0.000000e+00> : vector<8x512xf32>
    %95 = tpu.matmul %93, %11, %cst_29 {dimension_numbers = #tpu.dot_dimension_numbers<[1], [0], [0], [1], [0, 0, 1, 1], [], []>} : vector<8x128xbf16>, vector<128x512xbf16>, vector<8x512xf32> -> vector<8x512xf32>
    %96 = arith.addf %94, %95 : vector<8x512xf32>
    %97 = vector.extract_strided_slice %96 {offsets = [0, 0], sizes = [8, 384], strides = [1, 1]} : vector<8x512xf32> to vector<8x384xf32>
    %98 = arith.negf %97 : vector<8x384xf32>
    %99 = math.exp %98 : vector<8x384xf32>
    %cst_30 = arith.constant 1.000000e+00 : f32
    %100 = vector.broadcast %cst_30 : f32 to vector<8x384xf32>
    %101 = arith.addf %100, %99 : vector<8x384xf32>
    %102 = arith.divf %100, %101 : vector<8x384xf32>
    %103 = vector.extract_strided_slice %102 {offsets = [0, 0], sizes = [8, 128], strides = [1, 1]} : vector<8x384xf32> to vector<8x128xf32>
    %104 = vector.extract_strided_slice %102 {offsets = [0, 128], sizes = [8, 128], strides = [1, 1]} : vector<8x384xf32> to vector<8x128xf32>
    %105 = vector.extract_strided_slice %102 {offsets = [0, 256], sizes = [8, 128], strides = [1, 1]} : vector<8x384xf32> to vector<8x128xf32>
    %106 = vector.extract_strided_slice %96 {offsets = [0, 384], sizes = [8, 128], strides = [1, 1]} : vector<8x512xf32> to vector<8x128xf32>
    %107 = math.tanh %106 : vector<8x128xf32>
    %108 = arith.mulf %104, %90 : vector<8x128xf32>
    %109 = arith.mulf %103, %107 : vector<8x128xf32>
    %110 = arith.addf %108, %109 : vector<8x128xf32>
    %111 = math.tanh %110 : vector<8x128xf32>
    %112 = arith.mulf %105, %111 : vector<8x128xf32>
    %113 = arith.truncf %112 : vector<8x128xf32> to vector<8x128xbf16>
    %c40 = arith.constant 40 : index
    %c0_31 = arith.constant 0 : index
    %114 = vector.load %arg11[%c40, %c0_31] : memref<64x512xf32, #tpu.memory_space<vmem>>, vector<8x512xf32>
    %cst_32 = arith.constant dense<0.000000e+00> : vector<8x512xf32>
    %115 = tpu.matmul %113, %11, %cst_32 {dimension_numbers = #tpu.dot_dimension_numbers<[1], [0], [0], [1], [0, 0, 1, 1], [], []>} : vector<8x128xbf16>, vector<128x512xbf16>, vector<8x512xf32> -> vector<8x512xf32>
    %116 = arith.addf %114, %115 : vector<8x512xf32>
    %117 = vector.extract_strided_slice %116 {offsets = [0, 0], sizes = [8, 384], strides = [1, 1]} : vector<8x512xf32> to vector<8x384xf32>
    %118 = arith.negf %117 : vector<8x384xf32>
    %119 = math.exp %118 : vector<8x384xf32>
    %cst_33 = arith.constant 1.000000e+00 : f32
    %120 = vector.broadcast %cst_33 : f32 to vector<8x384xf32>
    %121 = arith.addf %120, %119 : vector<8x384xf32>
    %122 = arith.divf %120, %121 : vector<8x384xf32>
    %123 = vector.extract_strided_slice %122 {offsets = [0, 0], sizes = [8, 128], strides = [1, 1]} : vector<8x384xf32> to vector<8x128xf32>
    %124 = vector.extract_strided_slice %122 {offsets = [0, 128], sizes = [8, 128], strides = [1, 1]} : vector<8x384xf32> to vector<8x128xf32>
    %125 = vector.extract_strided_slice %122 {offsets = [0, 256], sizes = [8, 128], strides = [1, 1]} : vector<8x384xf32> to vector<8x128xf32>
    %126 = vector.extract_strided_slice %116 {offsets = [0, 384], sizes = [8, 128], strides = [1, 1]} : vector<8x512xf32> to vector<8x128xf32>
    %127 = math.tanh %126 : vector<8x128xf32>
    %128 = arith.mulf %124, %110 : vector<8x128xf32>
    %129 = arith.mulf %123, %127 : vector<8x128xf32>
    %130 = arith.addf %128, %129 : vector<8x128xf32>
    %131 = math.tanh %130 : vector<8x128xf32>
    %132 = arith.mulf %125, %131 : vector<8x128xf32>
    %133 = arith.truncf %132 : vector<8x128xf32> to vector<8x128xbf16>
    %c48 = arith.constant 48 : index
    %c0_34 = arith.constant 0 : index
    %134 = vector.load %arg11[%c48, %c0_34] : memref<64x512xf32, #tpu.memory_space<vmem>>, vector<8x512xf32>
    %cst_35 = arith.constant dense<0.000000e+00> : vector<8x512xf32>
    %135 = tpu.matmul %133, %11, %cst_35 {dimension_numbers = #tpu.dot_dimension_numbers<[1], [0], [0], [1], [0, 0, 1, 1], [], []>} : vector<8x128xbf16>, vector<128x512xbf16>, vector<8x512xf32> -> vector<8x512xf32>
    %136 = arith.addf %134, %135 : vector<8x512xf32>
    %137 = vector.extract_strided_slice %136 {offsets = [0, 0], sizes = [8, 384], strides = [1, 1]} : vector<8x512xf32> to vector<8x384xf32>
    %138 = arith.negf %137 : vector<8x384xf32>
    %139 = math.exp %138 : vector<8x384xf32>
    %cst_36 = arith.constant 1.000000e+00 : f32
    %140 = vector.broadcast %cst_36 : f32 to vector<8x384xf32>
    %141 = arith.addf %140, %139 : vector<8x384xf32>
    %142 = arith.divf %140, %141 : vector<8x384xf32>
    %143 = vector.extract_strided_slice %142 {offsets = [0, 0], sizes = [8, 128], strides = [1, 1]} : vector<8x384xf32> to vector<8x128xf32>
    %144 = vector.extract_strided_slice %142 {offsets = [0, 128], sizes = [8, 128], strides = [1, 1]} : vector<8x384xf32> to vector<8x128xf32>
    %145 = vector.extract_strided_slice %142 {offsets = [0, 256], sizes = [8, 128], strides = [1, 1]} : vector<8x384xf32> to vector<8x128xf32>
    %146 = vector.extract_strided_slice %136 {offsets = [0, 384], sizes = [8, 128], strides = [1, 1]} : vector<8x512xf32> to vector<8x128xf32>
    %147 = math.tanh %146 : vector<8x128xf32>
    %148 = arith.mulf %144, %130 : vector<8x128xf32>
    %149 = arith.mulf %143, %147 : vector<8x128xf32>
    %150 = arith.addf %148, %149 : vector<8x128xf32>
    %151 = math.tanh %150 : vector<8x128xf32>
    %152 = arith.mulf %145, %151 : vector<8x128xf32>
    %153 = arith.truncf %152 : vector<8x128xf32> to vector<8x128xbf16>
    %c56 = arith.constant 56 : index
    %c0_37 = arith.constant 0 : index
    %154 = vector.load %arg11[%c56, %c0_37] : memref<64x512xf32, #tpu.memory_space<vmem>>, vector<8x512xf32>
    %cst_38 = arith.constant dense<0.000000e+00> : vector<8x512xf32>
    %155 = tpu.matmul %153, %11, %cst_38 {dimension_numbers = #tpu.dot_dimension_numbers<[1], [0], [0], [1], [0, 0, 1, 1], [], []>} : vector<8x128xbf16>, vector<128x512xbf16>, vector<8x512xf32> -> vector<8x512xf32>
    %156 = arith.addf %154, %155 : vector<8x512xf32>
    %157 = vector.extract_strided_slice %156 {offsets = [0, 0], sizes = [8, 384], strides = [1, 1]} : vector<8x512xf32> to vector<8x384xf32>
    %158 = arith.negf %157 : vector<8x384xf32>
    %159 = math.exp %158 : vector<8x384xf32>
    %cst_39 = arith.constant 1.000000e+00 : f32
    %160 = vector.broadcast %cst_39 : f32 to vector<8x384xf32>
    %161 = arith.addf %160, %159 : vector<8x384xf32>
    %162 = arith.divf %160, %161 : vector<8x384xf32>
    %163 = vector.extract_strided_slice %162 {offsets = [0, 0], sizes = [8, 128], strides = [1, 1]} : vector<8x384xf32> to vector<8x128xf32>
    %164 = vector.extract_strided_slice %162 {offsets = [0, 128], sizes = [8, 128], strides = [1, 1]} : vector<8x384xf32> to vector<8x128xf32>
    %165 = vector.extract_strided_slice %162 {offsets = [0, 256], sizes = [8, 128], strides = [1, 1]} : vector<8x384xf32> to vector<8x128xf32>
    %166 = vector.extract_strided_slice %156 {offsets = [0, 384], sizes = [8, 128], strides = [1, 1]} : vector<8x512xf32> to vector<8x128xf32>
    %167 = math.tanh %166 : vector<8x128xf32>
    %168 = arith.mulf %164, %150 : vector<8x128xf32>
    %169 = arith.mulf %163, %167 : vector<8x128xf32>
    %170 = arith.addf %168, %169 : vector<8x128xf32>
    %171 = math.tanh %170 : vector<8x128xf32>
    %172 = arith.mulf %165, %171 : vector<8x128xf32>
    %173 = arith.truncf %172 : vector<8x128xf32> to vector<8x128xbf16>
    %c0_40 = arith.constant 0 : index
    %c0_41 = arith.constant 0 : index
    %174 = vector.load %arg12[%c0_40, %c0_41] : memref<8x128xbf16, #tpu.memory_space<vmem>>, vector<8x128xbf16>
    tpu.vector_store %arg12[%c0_40, %c0_41], %173 {strides = array<i32>} : memref<8x128xbf16, #tpu.memory_space<vmem>>, vector<8x128xbf16>,
    %c0_42 = arith.constant 0 : index
    %c0_43 = arith.constant 0 : index
    %175 = vector.load %arg13[%c0_42, %c0_43] : memref<8x128xf32, #tpu.memory_space<vmem>>, vector<8x128xf32>
    tpu.vector_store %arg13[%c0_42, %c0_43], %170 {strides = array<i32>} : memref<8x128xf32, #tpu.memory_space<vmem>>, vector<8x128xf32>,
    %c0_i32_44 = arith.constant 0 : i32
    %176 = arith.cmpi eq, %arg1, %c0_i32_44 : i32
    %177 = arith.extui %176 : i1 to i32
    %c0_i32_45 = arith.constant 0 : i32
    %178 = arith.cmpi ne, %177, %c0_i32_45 : i32
    scf.if %178 {
      %c0_46 = arith.constant 0 : index
      %c0_47 = arith.constant 0 : index
      %179 = vector.load %arg12[%c0_46, %c0_47] : memref<8x128xbf16, #tpu.memory_space<vmem>>, vector<8x128xbf16>
      %180 = arith.extf %179 : vector<8x128xbf16> to vector<8x128xf32>
      %c0_48 = arith.constant 0 : index
      %c0_49 = arith.constant 0 : index
      %181 = vector.load %arg7[%c0_48, %c0_49] : memref<128x128xf32, #tpu.memory_space<vmem>>, vector<128x128xf32>
      %cst_50 = arith.constant dense<0.000000e+00> : vector<8x128xf32>
      %182 = tpu.matmul %180, %181, %cst_50 {dimension_numbers = #tpu.dot_dimension_numbers<[1], [0], [0], [1], [0, 0, 1, 1], [], []>} : vector<8x128xf32>, vector<128x128xf32>, vector<8x128xf32> -> vector<8x128xf32>
      %c0_51 = arith.constant 0 : index
      %c0_52 = arith.constant 0 : index
      %183 = vector.load %arg6[%c0_51, %c0_52] : memref<8x1xf32, #tpu.memory_space<vmem>>, vector<8x1xf32>
      %c0_53 = arith.constant 0 : index
      %c0_54 = arith.constant 0 : index
      %184 = vector.load %arg8[%c0_53, %c0_54] : memref<1x128xf32, #tpu.memory_space<vmem>>, vector<1x128xf32>
      %185 = vector.broadcast %183 : vector<8x1xf32> to vector<8x128xf32>
      %186 = vector.broadcast %184 : vector<1x128xf32> to vector<8x128xf32>
      %187 = arith.mulf %185, %186 : vector<8x128xf32>
      %188 = arith.addf %182, %187 : vector<8x128xf32>
      %c0_55 = arith.constant 0 : index
      %c0_56 = arith.constant 0 : index
      %189 = vector.load %arg9[%c0_55, %c0_56] : memref<1x128xf32, #tpu.memory_space<vmem>>, vector<1x128xf32>
      %190 = vector.broadcast %189 : vector<1x128xf32> to vector<8x128xf32>
      %191 = arith.addf %188, %190 : vector<8x128xf32>
      %c0_57 = arith.constant 0 : index
      %c0_58 = arith.constant 0 : index
      %192 = vector.load %arg10[%c0_57, %c0_58] : memref<8x128xf32, #tpu.memory_space<vmem>>, vector<8x128xf32>
      tpu.vector_store %arg10[%c0_57, %c0_58], %191 {strides = array<i32>} : memref<8x128xf32, #tpu.memory_space<vmem>>, vector<8x128xf32>,
    } else {
    }
    return
  }
  func.func @transform_0(%arg0: i32, %arg1: i32) -> (i32, i32, i32) {
    %c0_i32 = arith.constant 0 : i32
    %c0_i32_0 = arith.constant 0 : i32
    return %arg0, %arg1, %c0_i32 : i32, i32, i32
  }
  func.func @transform_1(%arg0: i32, %arg1: i32) -> (i32, i32) {
    %c0_i32 = arith.constant 0 : i32
    %c0_i32_0 = arith.constant 0 : i32
    %c0_i32_1 = arith.constant 0 : i32
    return %c0_i32, %c0_i32_0 : i32, i32
  }
  func.func @transform_2(%arg0: i32, %arg1: i32) -> (i32, i32) {
    %c0_i32 = arith.constant 0 : i32
    %c0_i32_0 = arith.constant 0 : i32
    %c0_i32_1 = arith.constant 0 : i32
    return %c0_i32, %c0_i32_0 : i32, i32
  }
  func.func @transform_3(%arg0: i32, %arg1: i32) -> (i32, i32) {
    %c0_i32 = arith.constant 0 : i32
    %c0_i32_0 = arith.constant 0 : i32
    %c0_i32_1 = arith.constant 0 : i32
    return %c0_i32, %c0_i32_0 : i32, i32
  }
  func.func @transform_4(%arg0: i32, %arg1: i32) -> (i32, i32) {
    %c0_i32 = arith.constant 0 : i32
    %c0_i32_0 = arith.constant 0 : i32
    return %arg0, %c0_i32 : i32, i32
  }
  func.func @transform_5(%arg0: i32, %arg1: i32) -> (i32, i32) {
    %c0_i32 = arith.constant 0 : i32
    %c0_i32_0 = arith.constant 0 : i32
    %c0_i32_1 = arith.constant 0 : i32
    return %c0_i32, %c0_i32_0 : i32, i32
  }
  func.func @transform_6(%arg0: i32, %arg1: i32) -> (i32, i32) {
    %c0_i32 = arith.constant 0 : i32
    %c0_i32_0 = arith.constant 0 : i32
    %c0_i32_1 = arith.constant 0 : i32
    return %c0_i32, %c0_i32_0 : i32, i32
  }
  func.func @transform_7(%arg0: i32, %arg1: i32) -> (i32, i32) {
    %c0_i32 = arith.constant 0 : i32
    %c0_i32_0 = arith.constant 0 : i32
    %c0_i32_1 = arith.constant 0 : i32
    return %c0_i32, %c0_i32_0 : i32, i32
  }
  func.func @transform_8(%arg0: i32, %arg1: i32) -> (i32, i32) {
    %c0_i32 = arith.constant 0 : i32
    %c0_i32_0 = arith.constant 0 : i32
    return %arg0, %c0_i32 : i32, i32
  }
}

</mosaic_0001>

<bundles_post_ra>
// kernel: tpu_custom_call.1
= control target key start
LH: loop header
LB: loop body
LE: loop exit
PB: predicated region body
PF: predicated region fallthrough
CT: control target
= control target key end

     0   :  { %13 = vsyncpa [#allocation6], 0  ;;  %s4875_s0 = inlined_call_operand.hbm [shape: bf16[1,64,768], index: 0, kind: input, shape index: {}]   ;;  %s4876_s1 = inlined_call_operand.hbm [shape: bf16[768,512], index: 1, kind: input, shape index: {}]   ;;  %s4877_s2 = inlined_call_operand.hbm [shape: bf16[128,512], index: 2, kind: input, shape index: {}]   ;;  %s4878_s3 = inlined_call_operand.vmem [shape: f32[1,512], index: 3, kind: input, shape index: {}]   ;;  %s4879_s4 = inlined_call_operand.vmem [shape: f32[8,1], index: 4, kind: input, shape index: {}]   ;;  %s4880_s5 = inlined_call_operand.hbm [shape: f32[128,128], index: 5, kind: input, shape index: {}]   ;;  %s4881_s6 = inlined_call_operand.vmem [shape: f32[1,128], index: 6, kind: input, shape index: {}]   ;;  %s4882_s7 = inlined_call_operand.vmem [shape: f32[1,128], index: 7, kind: input, shape index: {}]   ;;  %s4883_s8 = inlined_call_operand.hbm [shape: f32[8,128], index: 8, kind: output, shape index: {}]  }
   0x1   :  { %14 = vsyncpa [#allocation9], 0 }
   0x2   :  { %15 = vsyncpa [#allocation12], 0 }
   0x3   :  { %16 = vsyncpa [#allocation7], 0  ;;  %s4108_s27 = smov [#allocation8]  }
   0x4   :  { %s34_s28 = sshll.u32 %s4108_s27, 4  ;;  %s35_s28 = int_to_ptr.vmem [resolvable:$true] %s34_s28 }
   0x5   :  { %s4008_s29 = scalar_lea.vmem %s35_s28, 24576  ;;  %p4013_p1 = scmp.lt.s32.totalorder %s35_s28, %s35_s28 }
   0x6   :  { %p4009_p0 = scmp.ne.s32.totalorder %s35_s28, %s4008_s29  ;;  %p4014_p2 = scmp.lt.s32.totalorder %s4008_s29, %s4008_s29 }
   0x8   :  { %p4015_p3 = por %p4014_p2, %p4013_p1 }
   0xa   :  { %p4016_p4 = pnand %p4015_p3, %p4009_p0 }
   0xc   :  { %4019 = shalt.err (!%p4016_p4)
}
   0xd   :  { %s4109_s30 = smov 256   ;;  %s4110_s9 = smov 16  }
   0xe   :  { %40 = dma.hbm_to_vmem [thread:$0]  %s4876_s1, 24576, %s35_s28, [#allocation9], %s4109_s30, %s4109_s30, %s4110_s9  }
   0xf   :  { %s4111_s12 = smov [#allocation5]  }
  0x10   :  { %s22_s13 = sshll.u32 %s4111_s12, 4  ;;  %s23_s13 = int_to_ptr.vmem [resolvable:$true] %s22_s13 }
  0x11   :  { %s4028_s14 = scalar_lea.vmem %s23_s13, 3072  ;;  %p4033_p6 = scmp.lt.s32.totalorder %s23_s13, %s23_s13 }
  0x12   :  { %p4029_p5 = scmp.ne.s32.totalorder %s23_s13, %s4028_s14  ;;  %p4034_p7 = scmp.lt.s32.totalorder %s4028_s14, %s4028_s14 }
  0x14   :  { %p4035_p8 = por %p4034_p7, %p4033_p6 }
  0x16   :  { %p4036_p9 = pnand %p4035_p8, %p4029_p5 }
  0x18   :  { %4039 = shalt.err (!%p4036_p9)
}
  0x19   :  { %s4112_s15 = smov 384   ;;  %s4113_s16 = smov 24  }
  0x1a   :  { %28 = dma.hbm_to_vmem [thread:$0]  %s4875_s0, 3072, %s23_s13, [#allocation6], %s4112_s15, %s4112_s15, %s4113_s16  }
  0x1b   :  { %s4114_s19 = smov [#allocation10]   ;;  %s4115_s21 = smov [#allocation11]  }
  0x1c   :  { %s46_s20 = sshll.u32 %s4114_s19, 4  ;;  %s62_s1 = sshll.u32 %s4115_s21, 4  ;;  %s47_s20 = int_to_ptr.vmem [resolvable:$true] %s46_s20  ;;  %s63_s1 = int_to_ptr.vmem [resolvable:$true] %s62_s1 }
  0x1d   :  { %s4048_s22 = scalar_lea.vmem %s47_s20, 4096  ;;  %p4053_p11 = scmp.lt.s32.totalorder %s47_s20, %s47_s20 }
  0x1e   :  { %p4049_p10 = scmp.ne.s32.totalorder %s47_s20, %s4048_s22  ;;  %p4054_p12 = scmp.lt.s32.totalorder %s4048_s22, %s4048_s22 }
  0x20   :  { %p4055_p13 = por %p4054_p12, %p4053_p11 }
  0x22   :  { %p4056_p0 = pnand %p4055_p13, %p4049_p10 }
  0x24   :  { %4059 = shalt.err (!%p4056_p0)
}
  0x25   :  { %52 = dma.hbm_to_vmem [thread:$0]  %s4877_s2, 4096, %s47_s20, [#allocation9], %s4109_s30, %s4109_s30, %s4110_s9  }
  0x26   :  { %s4068_s0 = scalar_lea.vmem %s63_s1, 2048  ;;  %p4073_p2 = scmp.lt.s32.totalorder %s63_s1, %s63_s1 }
  0x27   :  { %p4069_p1 = scmp.ne.s32.totalorder %s63_s1, %s4068_s0  ;;  %p4074_p3 = scmp.lt.s32.totalorder %s4068_s0, %s4068_s0 }
  0x29   :  { %p4075_p4 = por %p4074_p3, %p4073_p2 }
  0x2b   :  { %p4076_p5 = pnand %p4075_p4, %p4069_p1 }
  0x2d   :  { %4079 = shalt.err (!%p4076_p5)
}
  0x2e   :  { %s4116_s25 = smov 128   ;;  %s4117_s26 = smov 8  }
  0x2f   :  { %68 = dma.hbm_to_vmem [thread:$0]  %s4880_s5, 2048, %s63_s1, [#allocation12], %s4116_s25, %s4116_s25, %s4117_s26  }
  0x30   :  { %4100 = dma.done.wait [#allocation6], 3072  }
  0x31   :  { %4101 = vsyncadd [#allocation6], 4294964224 }
  0x32   :  { %4102 = dma.done.wait [#allocation9], 28672  }
  0x33   :  { %4103 = vsyncadd [#allocation9], 4294938624 }
  0x34   :  { %4104 = dma.done.wait [#allocation12], 2048  }
  0x35   :  { %4105 = vsyncadd [#allocation12], 4294965248  ;;  %v3468_v0 = vld [vmem:[#allocation8 + $0xe4] ss:$16 sps:$4 sm:$0xff]   ;;  %v3472_v2 = vld [vmem:[#allocation8 + $0xe0] ss:$16 sps:$4 sm:$0xff]  }
  0x36   :  { %v3470_v1 = vld [vmem:[#allocation8 + $0x2e4] ss:$16 sps:$4 sm:$0xff]   ;;  %1410 = vmatprep.subr.bf16.mxu0 %v3468_v0  ;;  %v3473_v3 = vld [vmem:[#allocation8 + $0x2e0] ss:$16 sps:$4 sm:$0xff]   ;;  %vm4120_vm0 = vmmov 0   ;;  %s4121_s11 = smov [#allocation13]  }
  0x37   :  { %1483 = vmatprep.subr.bf16.mxu1 %v3470_v1  ;;  %v3474_v4 = vld [vmem:[#allocation8 + $0xc4] ss:$16 sps:$4 sm:$0xff]   ;;  %1411 = vmatpush1.bf16.msra.mxu0 %v3472_v2  ;;  %v3478_v6 = vld [vmem:[#allocation8 + $0xc0] ss:$16 sps:$4 sm:$0xff]   ;;  %s3116_s12 = sshll.u32 %s4121_s11, 4  ;;  %s3117_s12 = int_to_ptr.vmem [resolvable:$true] %s3116_s12 }
  0x38   :  { %1484 = vmatpush1.bf16.msra.mxu1 %v3473_v3  ;;  %v3476_v5 = vld [vmem:[#allocation8 + $0x2c4] ss:$16 sps:$4 sm:$0xff]   ;;  %1412 = vmatprep.subr.bf16.mxu0 %v3474_v4  ;;  %v3479_v7 = vld [vmem:[#allocation8 + $0x2c0] ss:$16 sps:$4 sm:$0xff]   ;;  %v3575_v3 = vld [vmem:[#allocation8 + $0xec] ss:$16 sps:$4 sm:$0xff]   ;;  %p4085_p7 = scmp.lt.s32.totalorder %s3117_s12, %s3117_s12 }
  0x39   :  { %1485 = vmatprep.subr.bf16.mxu1 %v3476_v5  ;;  %v3480_v8 = vld [vmem:[#allocation8 + $0xa4] ss:$16 sps:$4 sm:$0xff]   ;;  %v3484_v10 = vld [vmem:[#allocation8 + $0xa0] ss:$16 sps:$4 sm:$0xff]   ;;  %s4080_s13 = scalar_lea.vmem %s3117_s12, 128 }
  0x3a   :  { %v3482_v9 = vld [vmem:[#allocation8 + $0x2a4] ss:$16 sps:$4 sm:$0xff]   ;;  %v3485_v11 = vld [vmem:[#allocation8 + $0x2a0] ss:$16 sps:$4 sm:$0xff]   ;;  %p4081_p6 = scmp.ne.s32.totalorder %s3117_s12, %s4080_s13  ;;  %p4086_p8 = scmp.lt.s32.totalorder %s4080_s13, %s4080_s13 }
  0x3b   :  { %1413 = vmatpush1.bf16.msra.mxu0 %v3478_v6  ;;  %v3486_v12 = vld [vmem:[#allocation8 + $0x84] ss:$16 sps:$4 sm:$0xff]   ;;  %v3490_v14 = vld [vmem:[#allocation8 + $0x80] ss:$16 sps:$4 sm:$0xff]  }
  0x3c   :  { %1486 = vmatpush1.bf16.msra.mxu1 %v3479_v7  ;;  %1414 = vmatprep.subr.bf16.mxu0 %v3480_v8  ;;  %v3488_v13 = vld [vmem:[#allocation8 + $0x284] ss:$16 sps:$4 sm:$0xff]   ;;  %v3491_v15 = vld [vmem:[#allocation8 + $0x280] ss:$16 sps:$4 sm:$0xff]   ;;  %v3573_v7 = vld [vmem:[#allocation8 + $0xe8] ss:$16 sps:$4 sm:$0xff]   ;;  %p4087_p9 = por %p4086_p8, %p4085_p7 }
  0x3d   :  { %1487 = vmatprep.subr.bf16.mxu1 %v3482_v9  ;;  %v3492_v16 = vld [vmem:[#allocation8 + $0x64] ss:$16 sps:$4 sm:$0xff]   ;;  %v3496_v18 = vld [vmem:[#allocation8 + $0x60] ss:$16 sps:$4 sm:$0xff]   ;;  %v3581_v9 = vld [vmem:[#allocation8 + $0xcc] ss:$16 sps:$4 sm:$0xff]  }
  0x3e   :  { %v3494_v17 = vld [vmem:[#allocation8 + $0x264] ss:$16 sps:$4 sm:$0xff]   ;;  %v3497_v19 = vld [vmem:[#allocation8 + $0x260] ss:$16 sps:$4 sm:$0xff]   ;;  %p4088_p10 = pnand %p4087_p9, %p4081_p6 }
  0x3f   :  { %1415 = vmatpush1.bf16.msra.mxu0 %v3484_v10  ;;  %v3498_v20 = vld [vmem:[#allocation8 + $0x44] ss:$16 sps:$4 sm:$0xff]   ;;  %v3502_v22 = vld [vmem:[#allocation8 + $0x40] ss:$16 sps:$4 sm:$0xff]  }
  0x40   :  { %1488 = vmatpush1.bf16.msra.mxu1 %v3485_v11  ;;  %1416 = vmatprep.subr.bf16.mxu0 %v3486_v12  ;;  %v3500_v21 = vld [vmem:[#allocation8 + $0x244] ss:$16 sps:$4 sm:$0xff]   ;;  %v3503_v23 = vld [vmem:[#allocation8 + $0x240] ss:$16 sps:$4 sm:$0xff]   ;;  %v3579_v11 = vld [vmem:[#allocation8 + $0xc8] ss:$16 sps:$4 sm:$0xff]  }
  0x41   :  { %1489 = vmatprep.subr.bf16.mxu1 %v3488_v13  ;;  %v3504_v24 = vld [vmem:[#allocation8 + $0x24] ss:$16 sps:$4 sm:$0xff]   ;;  %v3508_v26 = vld [vmem:[#allocation8 + $0x20] ss:$16 sps:$4 sm:$0xff]   ;;  %v3587_v13 = vld [vmem:[#allocation8 + $0xac] ss:$16 sps:$4 sm:$0xff]  }
  0x42   :  { %v3506_v25 = vld [vmem:[#allocation8 + $0x224] ss:$16 sps:$4 sm:$0xff]   ;;  %v3509_v27 = vld [vmem:[#allocation8 + $0x220] ss:$16 sps:$4 sm:$0xff]  }
  0x43   :  { %1417 = vmatpush1.bf16.msra.mxu0 %v3490_v14  ;;  %v3510_v28 = vld [vmem:[#allocation8 + $0x4] ss:$16 sps:$4 sm:$0xff]   ;;  %v3514_v30 = vld [vmem:[#allocation8] ss:$16 sps:$4 sm:$0xff]  }
  0x44   :  { %1490 = vmatpush1.bf16.msra.mxu1 %v3491_v15  ;;  %1418 = vmatprep.subr.bf16.mxu0 %v3492_v16  ;;  %v3512_v29 = vld [vmem:[#allocation8 + $0x204] ss:$16 sps:$4 sm:$0xff]   ;;  %v3515_v31 = vld [vmem:[#allocation8 + $0x200] ss:$16 sps:$4 sm:$0xff]  }
  0x45   :  { %1491 = vmatprep.subr.bf16.mxu1 %v3494_v17  ;;  %v3516_v32 = vld [vmem:[#allocation8 + $0x1e4] ss:$16 sps:$4 sm:$0xff]   ;;  %v3520_v34 = vld [vmem:[#allocation8 + $0x1e0] ss:$16 sps:$4 sm:$0xff]  }
  0x46   :  { %v3518_v33 = vld [vmem:[#allocation8 + $0x3e4] ss:$16 sps:$4 sm:$0xff]   ;;  %v3521_v35 = vld [vmem:[#allocation8 + $0x3e0] ss:$16 sps:$4 sm:$0xff]  }
  0x47   :  { %1419 = vmatpush1.bf16.msra.mxu0 %v3496_v18  ;;  %v3522_v36 = vld [vmem:[#allocation8 + $0x1c4] ss:$16 sps:$4 sm:$0xff]   ;;  %v3526_v38 = vld [vmem:[#allocation8 + $0x1c0] ss:$16 sps:$4 sm:$0xff]   ;;  %v3585_v18 = vld [vmem:[#allocation8 + $0xa8] ss:$16 sps:$4 sm:$0xff]  }
  0x48   :  { %1492 = vmatpush1.bf16.msra.mxu1 %v3497_v19  ;;  %1420 = vmatprep.subr.bf16.mxu0 %v3498_v20  ;;  %v3524_v37 = vld [vmem:[#allocation8 + $0x3c4] ss:$16 sps:$4 sm:$0xff]   ;;  %v3527_v39 = vld [vmem:[#allocation8 + $0x3c0] ss:$16 sps:$4 sm:$0xff]   ;;  %v3593_v20 = vld [vmem:[#allocation8 + $0x8c] ss:$16 sps:$4 sm:$0xff]  }
  0x49   :  { %1493 = vmatprep.subr.bf16.mxu1 %v3500_v21  ;;  %v3528_v40 = vld [vmem:[#allocation8 + $0x1a4] ss:$16 sps:$4 sm:$0xff]   ;;  %v3532_v42 = vld [vmem:[#allocation8 + $0x1a0] ss:$16 sps:$4 sm:$0xff]  }
  0x4a   :  { %v3530_v41 = vld [vmem:[#allocation8 + $0x3a4] ss:$16 sps:$4 sm:$0xff]   ;;  %v3533_v43 = vld [vmem:[#allocation8 + $0x3a0] ss:$16 sps:$4 sm:$0xff]  }
  0x4b   :  { %1421 = vmatpush1.bf16.msra.mxu0 %v3502_v22  ;;  %v3534_v44 = vld [vmem:[#allocation8 + $0x184] ss:$16 sps:$4 sm:$0xff]   ;;  %v3538_v46 = vld [vmem:[#allocation8 + $0x180] ss:$16 sps:$4 sm:$0xff]  }
  0x4c   :  { %1494 = vmatpush1.bf16.msra.mxu1 %v3503_v23  ;;  %1422 = vmatprep.subr.bf16.mxu0 %v3504_v24  ;;  %v3536_v45 = vld [vmem:[#allocation8 + $0x384] ss:$16 sps:$4 sm:$0xff]   ;;  %v3539_v47 = vld [vmem:[#allocation8 + $0x380] ss:$16 sps:$4 sm:$0xff]   ;;  %v3591_v23 = vld [vmem:[#allocation8 + $0x88] ss:$16 sps:$4 sm:$0xff]  }
  0x4d   :  { %1495 = vmatprep.subr.bf16.mxu1 %v3506_v25  ;;  %v3540_v48 = vld [vmem:[#allocation8 + $0x164] ss:$16 sps:$4 sm:$0xff]   ;;  %v3544_v52 = vld [vmem:[#allocation8 + $0x160] ss:$16 sps:$4 sm:$0xff]   ;;  %v3599_v25 = vld [vmem:[#allocation8 + $0x6c] ss:$16 sps:$4 sm:$0xff]  }
  0x4e   :  { %v4185_v49 = vld [vmem:[#allocation5 + $0x4] ss:$24 sps:$4 sm:$0xff]   ;;  %v3545_v53 = vld [vmem:[#allocation8 + $0x360] ss:$16 sps:$4 sm:$0xff]   ;;  %v4197_v15 = vld [vmem:[#allocation5 + $0x34] ss:$24 sps:$4 sm:$0xff]  }
  0x4f   :  { %1423 = vmatpush1.bf16.msra.mxu0 %v3508_v26  ;;  %v3542_v50 = vld [vmem:[#allocation8 + $0x364] ss:$16 sps:$4 sm:$0xff]   ;;  %1442 = vmatprep.mubr.bf16.mxu0 %v4185_v49  ;;  %v3550_v56 = vld [vmem:[#allocation8 + $0x140] ss:$16 sps:$4 sm:$0xff]  }
  0x50   :  { %1496 = vmatpush1.bf16.msra.mxu1 %v3509_v27  ;;  %1424 = vmatprep.subr.bf16.mxu0 %v3510_v28  ;;  %v4187_v51 = vld [vmem:[#allocation5 + $0xc] ss:$24 sps:$4 sm:$0xff]   ;;  %v3551_v57 = vld [vmem:[#allocation8 + $0x340] ss:$16 sps:$4 sm:$0xff]   ;;  %v4201_v17 = vld [vmem:[#allocation5 + $0x3c] ss:$24 sps:$4 sm:$0xff]  }
  0x51   :  { %1497 = vmatprep.subr.bf16.mxu1 %v3512_v29  ;;  %1515 = vmatprep.mubr.bf16.mxu1 %v4187_v51  ;;  %v3546_v54 = vld [vmem:[#allocation8 + $0x144] ss:$16 sps:$4 sm:$0xff]   ;;  %v3556_v60 = vld [vmem:[#allocation8 + $0x120] ss:$16 sps:$4 sm:$0xff]  }
  0x52   :  { %v3548_v55 = vld [vmem:[#allocation8 + $0x344] ss:$16 sps:$4 sm:$0xff]   ;;  %v3557_v61 = vld [vmem:[#allocation8 + $0x320] ss:$16 sps:$4 sm:$0xff]  }
  0x53   :  { %1425 = vmatpush1.bf16.msra.mxu0 %v3514_v30  ;;  %v3552_v58 = vld [vmem:[#allocation8 + $0x124] ss:$16 sps:$4 sm:$0xff]   ;;  %v3562_v0 = vld [vmem:[#allocation8 + $0x100] ss:$16 sps:$4 sm:$0xff]   ;;  %v3597_v30 = vld [vmem:[#allocation8 + $0x68] ss:$16 sps:$4 sm:$0xff]  }
  0x54   :  { %1498 = vmatpush1.bf16.msra.mxu1 %v3515_v31  ;;  %1426 = vmatprep.subr.bf16.mxu0 %v3516_v32  ;;  %v3554_v59 = vld [vmem:[#allocation8 + $0x324] ss:$16 sps:$4 sm:$0xff]   ;;  %v3563_v1 = vld [vmem:[#allocation8 + $0x300] ss:$16 sps:$4 sm:$0xff]   ;;  %v3605_v32 = vld [vmem:[#allocation8 + $0x4c] ss:$16 sps:$4 sm:$0xff]  }
  0x55   :  { %1499 = vmatprep.subr.bf16.mxu1 %v3518_v33  ;;  %v3558_v62 = vld [vmem:[#allocation8 + $0x104] ss:$16 sps:$4 sm:$0xff]   ;;  %v4191_v4 = vld [vmem:[#allocation5] ss:$24 sps:$4 sm:$0xff]   ;;  %v4199_v16 = vld [vmem:[#allocation5 + $0x30] ss:$24 sps:$4 sm:$0xff]  }
  0x56   :  { %v3560_v63 = vld [vmem:[#allocation8 + $0x304] ss:$16 sps:$4 sm:$0xff]   ;;  %v4193_v5 = vld [vmem:[#allocation5 + $0x8] ss:$24 sps:$4 sm:$0xff]   ;;  %v4205_v21 = vld [vmem:[#allocation5 + $0x38] ss:$24 sps:$4 sm:$0xff]  }
  0x57   :  { %1427 = vmatpush2.bf16.msra.mxu0 %v3520_v34  ;;  %v3572_v2 = vld [vmem:[#allocation8 + $0x4e4] ss:$16 sps:$4 sm:$0xff]   ;;  %v3570_v6 = vld [vmem:[#allocation8 + $0x4e0] ss:$16 sps:$4 sm:$0xff]  }
  0x58   :  { %1500 = vmatpush2.bf16.msra.mxu1 %v3521_v35  ;;  %1428 = vmatprep.subr.bf16.mxu0 %v3522_v36  ;;  %v3578_v8 = vld [vmem:[#allocation8 + $0x4c4] ss:$16 sps:$4 sm:$0xff]   ;;  %v3576_v10 = vld [vmem:[#allocation8 + $0x4c0] ss:$16 sps:$4 sm:$0xff]   ;;  %v3603_v35 = vld [vmem:[#allocation8 + $0x48] ss:$16 sps:$4 sm:$0xff]  }
  0x59   :  { %1501 = vmatprep.subr.bf16.mxu1 %v3524_v37  ;;  %v3584_v12 = vld [vmem:[#allocation8 + $0x4a4] ss:$16 sps:$4 sm:$0xff]   ;;  %v3582_v14 = vld [vmem:[#allocation8 + $0x4a0] ss:$16 sps:$4 sm:$0xff]   ;;  %v3611_v37 = vld [vmem:[#allocation8 + $0x2c] ss:$16 sps:$4 sm:$0xff]  }
  0x5a   :  { %v3590_v19 = vld [vmem:[#allocation8 + $0x484] ss:$16 sps:$4 sm:$0xff]   ;;  %v3588_v22 = vld [vmem:[#allocation8 + $0x480] ss:$16 sps:$4 sm:$0xff]  }
  0x5b   :  { %1429 = vmatpush2.bf16.msra.mxu0 %v3526_v38  ;;  %v3596_v24 = vld [vmem:[#allocation8 + $0x464] ss:$16 sps:$4 sm:$0xff]   ;;  %v3594_v26 = vld [vmem:[#allocation8 + $0x460] ss:$16 sps:$4 sm:$0xff]  }
  0x5c   :  { %1502 = vmatpush2.bf16.msra.mxu1 %v3527_v39  ;;  %1430 = vmatprep.subr.bf16.mxu0 %v3528_v40  ;;  %v4209_v27 = vld [vmem:[#allocation5 + $0x64] ss:$24 sps:$4 sm:$0xff]   ;;  %v4211_v28 = vld [vmem:[#allocation5 + $0x60] ss:$24 sps:$4 sm:$0xff]   ;;  %v4221_v39 = vld [vmem:[#allocation5 + $0x94] ss:$24 sps:$4 sm:$0xff]  }
  0x5d   :  { %1503 = vmatprep.subr.bf16.mxu1 %v3530_v41  ;;  %v4213_v29 = vld [vmem:[#allocation5 + $0x6c] ss:$24 sps:$4 sm:$0xff]   ;;  %v4217_v33 = vld [vmem:[#allocation5 + $0x68] ss:$24 sps:$4 sm:$0xff]   ;;  %v4225_v41 = vld [vmem:[#allocation5 + $0x9c] ss:$24 sps:$4 sm:$0xff]  }
  0x5e   :  { %v3602_v31 = vld [vmem:[#allocation8 + $0x444] ss:$16 sps:$4 sm:$0xff]   ;;  %v3600_v34 = vld [vmem:[#allocation8 + $0x440] ss:$16 sps:$4 sm:$0xff]  }
  0x5f   :  { %1431 = vmatpush2.bf16.msra.mxu0 %v3532_v42  ;;  %v3608_v36 = vld [vmem:[#allocation8 + $0x424] ss:$16 sps:$4 sm:$0xff]   ;;  %v3606_v38 = vld [vmem:[#allocation8 + $0x420] ss:$16 sps:$4 sm:$0xff]   ;;  %v3609_v42 = vld [vmem:[#allocation8 + $0x28] ss:$16 sps:$4 sm:$0xff]  }
  0x60   :  { %1504 = vmatpush2.bf16.msra.mxu1 %v3533_v43  ;;  %1432 = vmatprep.subr.bf16.mxu0 %v3534_v44  ;;  %v4223_v40 = vld [vmem:[#allocation5 + $0x90] ss:$24 sps:$4 sm:$0xff]   ;;  %v3614_v43 = vld [vmem:[#allocation8 + $0x404] ss:$16 sps:$4 sm:$0xff]   ;;  %v3617_v44 = vld [vmem:[#allocation8 + $0xc] ss:$16 sps:$4 sm:$0xff]  }
  0x61   :  { %1505 = vmatprep.subr.bf16.mxu1 %v3536_v45  ;;  %v4229_v45 = vld [vmem:[#allocation5 + $0x98] ss:$24 sps:$4 sm:$0xff]  }
  0x63   :  { %1433 = vmatpush2.bf16.msra.mxu0 %v3538_v46  ;;  %v3612_v46 = vld [vmem:[#allocation8 + $0x400] ss:$16 sps:$4 sm:$0xff]  }
  0x64   :  { %1506 = vmatpush2.bf16.msra.mxu1 %v3539_v47  ;;  %1434 = vmatprep.subr.bf16.mxu0 %v3540_v48  ;;  %v3615_v47 = vld [vmem:[#allocation8 + $0x8] ss:$16 sps:$4 sm:$0xff]   ;;  %v4884_v48 = vmov 0  }
  0x65   :  { %1507 = vmatprep.subr.bf16.mxu1 %v3542_v50  ;;  %90 = vst [vmem:[#allocation3] sm:$0xf] %v4884_v48  ;;  %3467 = vset.pattern.permute.xlu0 %v4884_v48  ;;  %v3620_v50 = vld [vmem:[#allocation8 + $0x5e4] ss:$16 sps:$4 sm:$0xff]  }
  0x67   :  { %1435 = vmatpush2.bf16.msra.mxu0 %v3544_v52  ;;  %v3623_v52 = vld [vmem:[#allocation8 + $0x1ec] ss:$16 sps:$4 sm:$0xff]  }
  0x68   :  { %1508 = vmatpush2.bf16.msra.mxu1 %v3545_v53  ;;  %1436 = vmatprep.subr.bf16.mxu0 %v3546_v54  ;;  %v3618_v53 = vld [vmem:[#allocation8 + $0x5e0] ss:$16 sps:$4 sm:$0xff]   ;;  %v3621_v54 = vld [vmem:[#allocation8 + $0x1e8] ss:$16 sps:$4 sm:$0xff]  }
  0x69   :  { %1509 = vmatprep.subr.bf16.mxu1 %v3548_v55  ;;  %v3631_v55 = vld [vmem:[#allocation8 + $0x5c4] ss:$16 sps:$4 sm:$0xff]  }
  0x6b   :  { %1437 = vmatpush2.bf16.msra.mxu0 %v3550_v56  ;;  %v3634_v56 = vld [vmem:[#allocation8 + $0x1cc] ss:$16 sps:$4 sm:$0xff]  }
  0x6c   :  { %1510 = vmatpush2.bf16.msra.mxu1 %v3551_v57  ;;  %1438 = vmatprep.subr.bf16.mxu0 %v3552_v58  ;;  %v4236_v57 = vld [vmem:[#allocation5 + $0x14] ss:$24 sps:$4 sm:$0xff]   ;;  %v3629_v58 = vld [vmem:[#allocation8 + $0x5c0] ss:$16 sps:$4 sm:$0xff]  }
  0x6d   :  { %1511 = vmatprep.subr.bf16.mxu1 %v3554_v59  ;;  %v3632_v59 = vld [vmem:[#allocation8 + $0x1c8] ss:$16 sps:$4 sm:$0xff]  }
  0x6f   :  { %1439 = vmatpush2.bf16.msra.mxu0 %v3556_v60  ;;  %v3638_v60 = vld [vmem:[#allocation8 + $0x5a4] ss:$16 sps:$4 sm:$0xff]  }
  0x70   :  { %1512 = vmatpush2.bf16.msra.mxu1 %v3557_v61  ;;  %1440 = vmatprep.subr.bf16.mxu0 %v3558_v62  ;;  %v3641_v61 = vld [vmem:[#allocation8 + $0x1ac] ss:$16 sps:$4 sm:$0xff]   ;;  %v3636_v62 = vld [vmem:[#allocation8 + $0x5a0] ss:$16 sps:$4 sm:$0xff]  }
  0x71   :  { %1513 = vmatprep.subr.bf16.mxu1 %v3560_v63  ;;  %v3639_v63 = vld [vmem:[#allocation8 + $0x1a8] ss:$16 sps:$4 sm:$0xff]  }
  0x73   :  { %1441 = vmatpush2.bf16.msra.mxu0 %v3562_v0  ;;  %v3652_v0 = vld [vmem:[#allocation8 + $0x18c] ss:$16 sps:$4 sm:$0xff]  }
  0x74   :  { %1514 = vmatpush2.bf16.msra.mxu1 %v3563_v1  ;;  %1556 = vmatprep.subr.bf16.mxu0 %v3572_v2  ;;  %v3647_v1 = vld [vmem:[#allocation8 + $0x580] ss:$16 sps:$4 sm:$0xff]   ;;  %v3650_v2 = vld [vmem:[#allocation8 + $0x188] ss:$16 sps:$4 sm:$0xff]  }
  0x75   :  { %1629 = vmatprep.subr.bf16.mxu1 %v3575_v3  ;;  %v3656_v3 = vld [vmem:[#allocation8 + $0x564] ss:$16 sps:$4 sm:$0xff]  }
  0x76   :  { %1443 = vmatmul.mubr.bf16.vlgmr.msra.gmra.mxu0 %v4191_v4 }
  0x77   :  { %1516 = vmatmul.mubr.bf16.vlgmr.msra.gmra.mxu1 %v4193_v5  ;;  %1557 = vmatpush1.bf16.msra.mxu0 %v3570_v6  ;;  %v3659_v6 = vld [vmem:[#allocation8 + $0x16c] ss:$16 sps:$4 sm:$0xff]  }
  0x78   :  { %1630 = vmatpush1.bf16.msra.mxu1 %v3573_v7  ;;  %1558 = vmatprep.subr.bf16.mxu0 %v3578_v8  ;;  %v3654_v7 = vld [vmem:[#allocation8 + $0x560] ss:$16 sps:$4 sm:$0xff]   ;;  %v3657_v8 = vld [vmem:[#allocation8 + $0x168] ss:$16 sps:$4 sm:$0xff]  }
  0x79   :  { %1631 = vmatprep.subr.bf16.mxu1 %v3581_v9  ;;  %1452 = vmatprep.mubr.bf16.mxu0 %v4197_v15  ;;  %v3667_v9 = vld [vmem:[#allocation8 + $0x544] ss:$16 sps:$4 sm:$0xff]  }
  0x7a   :  { %1525 = vmatprep.mubr.bf16.mxu1 %v4201_v17 }
  0x7b   :  { %1559 = vmatpush1.bf16.msra.mxu0 %v3576_v10  ;;  %v3670_v10 = vld [vmem:[#allocation8 + $0x14c] ss:$16 sps:$4 sm:$0xff]  }
  0x7c   :  { %1632 = vmatpush1.bf16.msra.mxu1 %v3579_v11  ;;  %1560 = vmatprep.subr.bf16.mxu0 %v3584_v12  ;;  %v3665_v11 = vld [vmem:[#allocation8 + $0x540] ss:$16 sps:$4 sm:$0xff]   ;;  %v3668_v12 = vld [vmem:[#allocation8 + $0x148] ss:$16 sps:$4 sm:$0xff]  }
  0x7d   :  { %1633 = vmatprep.subr.bf16.mxu1 %v3587_v13  ;;  %v3674_v13 = vld [vmem:[#allocation8 + $0x524] ss:$16 sps:$4 sm:$0xff]  }
  0x7e   :  { %1453 = vmatmul.mubr.bf16.gmra.mxu0 %v4199_v16 }
  0x7f   :  { %1561 = vmatpush1.bf16.msra.mxu0 %v3582_v14  ;;  %1526 = vmatmul.mubr.bf16.gmra.mxu1 %v4205_v21  ;;  %v3677_v14 = vld [vmem:[#allocation8 + $0x12c] ss:$16 sps:$4 sm:$0xff]  }
  0x80   :  { %1634 = vmatpush1.bf16.msra.mxu1 %v3585_v18  ;;  %1562 = vmatprep.subr.bf16.mxu0 %v3590_v19  ;;  %v3672_v18 = vld [vmem:[#allocation8 + $0x520] ss:$16 sps:$4 sm:$0xff]   ;;  %v3675_v19 = vld [vmem:[#allocation8 + $0x128] ss:$16 sps:$4 sm:$0xff]  }
  0x81   :  { %1635 = vmatprep.subr.bf16.mxu1 %v3593_v20  ;;  %1462 = vmatprep.mubr.bf16.mxu0 %v4209_v27  ;;  %v3680_v20 = vld [vmem:[#allocation8 + $0x504] ss:$16 sps:$4 sm:$0xff]  }
  0x82   :  { %1535 = vmatprep.mubr.bf16.mxu1 %v4213_v29 }
  0x83   :  { %1563 = vmatpush1.bf16.msra.mxu0 %v3588_v22  ;;  %v3683_v22 = vld [vmem:[#allocation8 + $0x10c] ss:$16 sps:$4 sm:$0xff]  }
  0x84   :  { %1636 = vmatpush1.bf16.msra.mxu1 %v3591_v23  ;;  %1564 = vmatprep.subr.bf16.mxu0 %v3596_v24  ;;  %v3678_v23 = vld [vmem:[#allocation8 + $0x500] ss:$16 sps:$4 sm:$0xff]   ;;  %v3681_v24 = vld [vmem:[#allocation8 + $0x108] ss:$16 sps:$4 sm:$0xff]  }
  0x85   :  { %1637 = vmatprep.subr.bf16.mxu1 %v3599_v25  ;;  %v3689_v25 = vld [vmem:[#allocation8 + $0x2ec] ss:$16 sps:$4 sm:$0xff]  }
  0x86   :  { %1463 = vmatmul.mubr.bf16.gmra.mxu0 %v4211_v28 }
  0x87   :  { %1565 = vmatpush1.bf16.msra.mxu0 %v3594_v26  ;;  %1536 = vmatmul.mubr.bf16.gmra.mxu1 %v4217_v33  ;;  %v3692_v26 = vld [vmem:[#allocation8 + $0x4ec] ss:$16 sps:$4 sm:$0xff]  }
  0x88   :  { %1638 = vmatpush1.bf16.msra.mxu1 %v3597_v30  ;;  %1566 = vmatprep.subr.bf16.mxu0 %v3602_v31  ;;  %v4239_v30 = vld [vmem:[#allocation5 + $0x10] ss:$24 sps:$4 sm:$0xff]  }
  0x89   :  { %1639 = vmatprep.subr.bf16.mxu1 %v3605_v32  ;;  %1472 = vmatprep.mubr.bf16.mxu0 %v4221_v39  ;;  %v3687_v31 = vld [vmem:[#allocation8 + $0x2e8] ss:$16 sps:$4 sm:$0xff]  }
  0x8a   :  { %1545 = vmatprep.mubr.bf16.mxu1 %v4225_v41  ;;  %v3690_v32 = vld [vmem:[#allocation8 + $0x4e8] ss:$16 sps:$4 sm:$0xff]  }
  0x8b   :  { %1567 = vmatpush1.bf16.msra.mxu0 %v3600_v34  ;;  %v3695_v34 = vld [vmem:[#allocation8 + $0x2cc] ss:$16 sps:$4 sm:$0xff]  }
  0x8c   :  { %1640 = vmatpush1.bf16.msra.mxu1 %v3603_v35  ;;  %1568 = vmatprep.subr.bf16.mxu0 %v3608_v36  ;;  %v3698_v35 = vld [vmem:[#allocation8 + $0x4cc] ss:$16 sps:$4 sm:$0xff]  }
  0x8d   :  { %1641 = vmatprep.subr.bf16.mxu1 %v3611_v37  ;;  %v4241_v36 = vld [vmem:[#allocation5 + $0x44] ss:$24 sps:$4 sm:$0xff]   ;;  %v3693_v37 = vld [vmem:[#allocation8 + $0x2c8] ss:$16 sps:$4 sm:$0xff]  }
  0x8e   :  { %1473 = vmatmul.mubr.bf16.gmra.mxu0 %v4223_v40 }
  0x8f   :  { %1569 = vmatpush1.bf16.msra.mxu0 %v3606_v38  ;;  %1546 = vmatmul.mubr.bf16.gmra.mxu1 %v4229_v45  ;;  %v3696_v38 = vld [vmem:[#allocation8 + $0x4c8] ss:$16 sps:$4 sm:$0xff]  }
  0x90   :  { %1642 = vmatpush1.bf16.msra.mxu1 %v3609_v42  ;;  %1570 = vmatprep.subr.bf16.mxu0 %v3614_v43  ;;  %v3704_v42 = vld [vmem:[#allocation8 + $0x2ac] ss:$16 sps:$4 sm:$0xff]  }
  0x91   :  { %1643 = vmatprep.subr.bf16.mxu1 %v3617_v44  ;;  %1661 = vmatprep.mubr.bf16.mxu1 %v4185_v49  ;;  %v3649_v49 = vld [vmem:[#allocation8 + $0x584] ss:$16 sps:$4 sm:$0xff]   ;;  %v3707_v43 = vld [vmem:[#allocation8 + $0x4ac] ss:$16 sps:$4 sm:$0xff]   ;;  %v4246_v44 = vld [vmem:[#allocation5 + $0x40] ss:$24 sps:$4 sm:$0xff]  }
  0x92   :  { %1588 = vmatprep.mubr.bf16.mxu0 %v4236_v57 }
  0x93   :  { %1571 = vmatpush1.bf16.msra.mxu0 %v3612_v46  ;;  %v3702_v46 = vld [vmem:[#allocation8 + $0x2a8] ss:$16 sps:$4 sm:$0xff]  }
  0x94   :  { %1644 = vmatpush1.bf16.msra.mxu1 %v3615_v47  ;;  %1572 = vmatprep.subr.bf16.mxu0 %v3620_v50  ;;  %v3705_v47 = vld [vmem:[#allocation8 + $0x4a8] ss:$16 sps:$4 sm:$0xff]   ;;  %v3710_v50 = vld [vmem:[#allocation8 + $0x28c] ss:$16 sps:$4 sm:$0xff]  }
  0x95   :  { %1645 = vmatprep.subr.bf16.mxu1 %v3623_v52  ;;  %v4249_v52 = vld [vmem:[#allocation5 + $0x74] ss:$24 sps:$4 sm:$0xff]  }
  0x97   :  { %1573 = vmatpush2.bf16.msra.mxu0 %v3618_v53  ;;  %v3708_v53 = vld [vmem:[#allocation8 + $0x288] ss:$16 sps:$4 sm:$0xff]  }
  0x98   :  { %1646 = vmatpush2.bf16.msra.mxu1 %v3621_v54  ;;  %1574 = vmatprep.subr.bf16.mxu0 %v3631_v55  ;;  %v3711_v54 = vld [vmem:[#allocation8 + $0x488] ss:$16 sps:$4 sm:$0xff]   ;;  %v3719_v55 = vld [vmem:[#allocation8 + $0x26c] ss:$16 sps:$4 sm:$0xff]  }
  0x99   :  { %1647 = vmatprep.subr.bf16.mxu1 %v3634_v56  ;;  %v4254_v56 = vld [vmem:[#allocation5 + $0x70] ss:$24 sps:$4 sm:$0xff]  }
  0x9b   :  { %1575 = vmatpush2.bf16.msra.mxu0 %v3629_v58  ;;  %v3717_v58 = vld [vmem:[#allocation8 + $0x268] ss:$16 sps:$4 sm:$0xff]  }
  0x9c   :  { %1648 = vmatpush2.bf16.msra.mxu1 %v3632_v59  ;;  %1576 = vmatprep.subr.bf16.mxu0 %v3638_v60  ;;  %v3720_v59 = vld [vmem:[#allocation8 + $0x468] ss:$16 sps:$4 sm:$0xff]   ;;  %v3725_v60 = vld [vmem:[#allocation8 + $0x24c] ss:$16 sps:$4 sm:$0xff]  }
  0x9d   :  { %1649 = vmatprep.subr.bf16.mxu1 %v3641_v61  ;;  %v4257_v61 = vld [vmem:[#allocation5 + $0xa4] ss:$24 sps:$4 sm:$0xff]  }
  0x9f   :  { %1577 = vmatpush2.bf16.msra.mxu0 %v3636_v62  ;;  %v3723_v62 = vld [vmem:[#allocation8 + $0x248] ss:$16 sps:$4 sm:$0xff]  }
  0xa0   :  { %1650 = vmatpush2.bf16.msra.mxu1 %v3639_v63  ;;  %1578 = vmatprep.subr.bf16.mxu0 %v3649_v49  ;;  %v3726_v63 = vld [vmem:[#allocation8 + $0x448] ss:$16 sps:$4 sm:$0xff]   ;;  %v3734_v49 = vld [vmem:[#allocation8 + $0x22c] ss:$16 sps:$4 sm:$0xff]  }
  0xa1   :  { %1651 = vmatprep.subr.bf16.mxu1 %v3652_v0  ;;  %v4263_v0 = vld [vmem:[#allocation5 + $0xa0] ss:$24 sps:$4 sm:$0xff]  }
  0xa3   :  { %1579 = vmatpush2.bf16.msra.mxu0 %v3647_v1  ;;  %v3732_v1 = vld [vmem:[#allocation8 + $0x228] ss:$16 sps:$4 sm:$0xff]  }
  0xa4   :  { %1652 = vmatpush2.bf16.msra.mxu1 %v3650_v2  ;;  %1580 = vmatprep.subr.bf16.mxu0 %v3656_v3  ;;  %v3735_v2 = vld [vmem:[#allocation8 + $0x428] ss:$16 sps:$4 sm:$0xff]   ;;  %v3740_v3 = vld [vmem:[#allocation8 + $0x20c] ss:$16 sps:$4 sm:$0xff]  }
  0xa5   :  { %1653 = vmatprep.subr.bf16.mxu1 %v3659_v6  ;;  %v3738_v6 = vld [vmem:[#allocation8 + $0x208] ss:$16 sps:$4 sm:$0xff]  }
  0xa7   :  { %1581 = vmatpush2.bf16.msra.mxu0 %v3654_v7  ;;  %v3741_v7 = vld [vmem:[#allocation8 + $0x408] ss:$16 sps:$4 sm:$0xff]  }
  0xa8   :  { %1654 = vmatpush2.bf16.msra.mxu1 %v3657_v8  ;;  %1582 = vmatprep.subr.bf16.mxu0 %v3667_v9  ;;  %v3746_v8 = vld [vmem:[#allocation8 + $0x3ec] ss:$16 sps:$4 sm:$0xff]   ;;  %v3744_v9 = vld [vmem:[#allocation8 + $0x3e8] ss:$16 sps:$4 sm:$0xff]  }
  0xa9   :  { %1655 = vmatprep.subr.bf16.mxu1 %v3670_v10  ;;  %v3747_v10 = vld [vmem:[#allocation8 + $0x5e8] ss:$16 sps:$4 sm:$0xff]  }
  0xab   :  { %1583 = vmatpush2.bf16.msra.mxu0 %v3665_v11  ;;  %v3752_v11 = vld [vmem:[#allocation8 + $0x3cc] ss:$16 sps:$4 sm:$0xff]  }
  0xac   :  { %1656 = vmatpush2.bf16.msra.mxu1 %v3668_v12  ;;  %1584 = vmatprep.subr.bf16.mxu0 %v3674_v13  ;;  %v3755_v12 = vld [vmem:[#allocation8 + $0x5cc] ss:$16 sps:$4 sm:$0xff]   ;;  %v3753_v13 = vld [vmem:[#allocation8 + $0x5c8] ss:$16 sps:$4 sm:$0xff]  }
  0xad   :  { %1657 = vmatprep.subr.bf16.mxu1 %v3677_v14  ;;  %v3758_v14 = vld [vmem:[#allocation8 + $0x3ac] ss:$16 sps:$4 sm:$0xff]  }
  0xaf   :  { %1585 = vmatpush2.bf16.msra.mxu0 %v3672_v18  ;;  %v3761_v18 = vld [vmem:[#allocation8 + $0x5ac] ss:$16 sps:$4 sm:$0xff]  }
  0xb0   :  { %1658 = vmatpush2.bf16.msra.mxu1 %v3675_v19  ;;  %1586 = vmatprep.subr.bf16.mxu0 %v3680_v20  ;;  %v3764_v19 = vld [vmem:[#allocation8 + $0x38c] ss:$16 sps:$4 sm:$0xff]  }
  0xb1   :  { %1659 = vmatprep.subr.bf16.mxu1 %v3683_v22  ;;  %v3767_v20 = vld [vmem:[#allocation8 + $0x58c] ss:$16 sps:$4 sm:$0xff]   ;;  %v3762_v22 = vld [vmem:[#allocation8 + $0x388] ss:$16 sps:$4 sm:$0xff]  }
  0xb3   :  { %1587 = vmatpush2.bf16.msra.mxu0 %v3678_v23  ;;  %v3765_v23 = vld [vmem:[#allocation8 + $0x588] ss:$16 sps:$4 sm:$0xff]  }
  0xb4   :  { %1660 = vmatpush2.bf16.msra.mxu1 %v3681_v24  ;;  %1702 = vmatprep.subr.bf16.mxu0 %v3689_v25  ;;  %v3770_v24 = vld [vmem:[#allocation8 + $0x36c] ss:$16 sps:$4 sm:$0xff]  }
  0xb5   :  { %1775 = vmatprep.subr.bf16.mxu1 %v3692_v26  ;;  %v3773_v25 = vld [vmem:[#allocation8 + $0x56c] ss:$16 sps:$4 sm:$0xff]   ;;  %v3768_v26 = vld [vmem:[#allocation8 + $0x368] ss:$16 sps:$4 sm:$0xff]  }
  0xb6   :  { %1589 = vmatmul.mubr.bf16.vlgmr.msra.gmra.mxu0 %v4239_v30 }
  0xb7   :  { %1662 = vmatmul.mubr.bf16.vlgmr.msra.gmra.mxu1 %v4191_v4  ;;  %1703 = vmatpush1.bf16.msra.mxu0 %v3687_v31  ;;  %v3713_v4 = vld [vmem:[#allocation8 + $0x48c] ss:$16 sps:$4 sm:$0xff]   ;;  %v3771_v31 = vld [vmem:[#allocation8 + $0x568] ss:$16 sps:$4 sm:$0xff]  }
  0xb8   :  { %1776 = vmatpush1.bf16.msra.mxu1 %v3690_v32  ;;  %1704 = vmatprep.subr.bf16.mxu0 %v3695_v34  ;;  %v3776_v32 = vld [vmem:[#allocation8 + $0x34c] ss:$16 sps:$4 sm:$0xff]  }
  0xb9   :  { %1777 = vmatprep.subr.bf16.mxu1 %v3698_v35  ;;  %1598 = vmatprep.mubr.bf16.mxu0 %v4241_v36  ;;  %v3779_v34 = vld [vmem:[#allocation8 + $0x54c] ss:$16 sps:$4 sm:$0xff]   ;;  %v3774_v35 = vld [vmem:[#allocation8 + $0x348] ss:$16 sps:$4 sm:$0xff]  }
  0xba   :  { %1671 = vmatprep.mubr.bf16.mxu1 %v4197_v15  ;;  %v3722_v15 = vld [vmem:[#allocation8 + $0x46c] ss:$16 sps:$4 sm:$0xff]  }
  0xbb   :  { %1705 = vmatpush1.bf16.msra.mxu0 %v3693_v37  ;;  %v3777_v37 = vld [vmem:[#allocation8 + $0x548] ss:$16 sps:$4 sm:$0xff]  }
  0xbc   :  { %1778 = vmatpush1.bf16.msra.mxu1 %v3696_v38  ;;  %1706 = vmatprep.subr.bf16.mxu0 %v3704_v42  ;;  %v3782_v38 = vld [vmem:[#allocation8 + $0x32c] ss:$16 sps:$4 sm:$0xff]  }
  0xbd   :  { %1779 = vmatprep.subr.bf16.mxu1 %v3707_v43  ;;  %v3785_v42 = vld [vmem:[#allocation8 + $0x52c] ss:$16 sps:$4 sm:$0xff]   ;;  %v3780_v43 = vld [vmem:[#allocation8 + $0x328] ss:$16 sps:$4 sm:$0xff]  }
  0xbe   :  { %1599 = vmatmul.mubr.bf16.gmra.mxu0 %v4246_v44 }
  0xbf   :  { %1672 = vmatmul.mubr.bf16.gmra.mxu1 %v4199_v16  ;;  %1707 = vmatpush1.bf16.msra.mxu0 %v3702_v46  ;;  %v3728_v16 = vld [vmem:[#allocation8 + $0x44c] ss:$16 sps:$4 sm:$0xff]   ;;  %v3783_v46 = vld [vmem:[#allocation8 + $0x528] ss:$16 sps:$4 sm:$0xff]  }
  0xc0   :  { %1780 = vmatpush1.bf16.msra.mxu1 %v3705_v47  ;;  %1708 = vmatprep.subr.bf16.mxu0 %v3710_v50  ;;  %v3788_v47 = vld [vmem:[#allocation8 + $0x30c] ss:$16 sps:$4 sm:$0xff]  }
  0xc1   :  { %1781 = vmatprep.subr.bf16.mxu1 %v3713_v4  ;;  %1608 = vmatprep.mubr.bf16.mxu0 %v4249_v52  ;;  %v3791_v50 = vld [vmem:[#allocation8 + $0x50c] ss:$16 sps:$4 sm:$0xff]   ;;  %v3786_v4 = vld [vmem:[#allocation8 + $0x308] ss:$16 sps:$4 sm:$0xff]  }
  0xc2   :  { %1681 = vmatprep.mubr.bf16.mxu1 %v4209_v27  ;;  %v3737_v27 = vld [vmem:[#allocation8 + $0x42c] ss:$16 sps:$4 sm:$0xff]  }
  0xc3   :  { %1709 = vmatpush1.bf16.msra.mxu0 %v3708_v53  ;;  %v3789_v53 = vld [vmem:[#allocation8 + $0x508] ss:$16 sps:$4 sm:$0xff]  }
  0xc4   :  { %1782 = vmatpush1.bf16.msra.mxu1 %v3711_v54  ;;  %1710 = vmatprep.subr.bf16.mxu0 %v3719_v55  ;;  %v4269_v54 = vld [vmem:[#allocation10 + $0xe4] ss:$16 sps:$4 sm:$0xff]   ;;  %v4271_v55 = vld [vmem:[#allocation10 + $0xec] ss:$16 sps:$4 sm:$0xff]  }
  0xc5   :  { %1783 = vmatprep.subr.bf16.mxu1 %v3722_v15  ;;  %4910 = vst [vmem:[#allocation18_spill] sm:$0xff] %v4269_v54  ;;  %4911 = vst [vmem:[#allocation19_spill] sm:$0xff] %v4271_v55  ;;  %v4273_v15 = vld [vmem:[#allocation10 + $0xe0] ss:$16 sps:$4 sm:$0xff]  }
  0xc6   :  { %1609 = vmatmul.mubr.bf16.gmra.mxu0 %v4254_v56 }
  0xc7   :  { %1682 = vmatmul.mubr.bf16.gmra.mxu1 %v4211_v28  ;;  %1711 = vmatpush1.bf16.msra.mxu0 %v3717_v58  ;;  %v3743_v28 = vld [vmem:[#allocation8 + $0x40c] ss:$16 sps:$4 sm:$0xff]   ;;  %v4275_v58 = vld [vmem:[#allocation10 + $0xe8] ss:$16 sps:$4 sm:$0xff]  }
  0xc8   :  { %1784 = vmatpush1.bf16.msra.mxu1 %v3720_v59  ;;  %1712 = vmatprep.subr.bf16.mxu0 %v3725_v60  ;;  %v4279_v59 = vld [vmem:[#allocation10 + $0xc4] ss:$16 sps:$4 sm:$0xff]   ;;  %v4281_v60 = vld [vmem:[#allocation10 + $0xcc] ss:$16 sps:$4 sm:$0xff]  }
  0xc9   :  { %1785 = vmatprep.subr.bf16.mxu1 %v3728_v16  ;;  %1618 = vmatprep.mubr.bf16.mxu0 %v4257_v61  ;;  %v4287_v16 = vld [vmem:[#allocation10 + $0xc0] ss:$16 sps:$4 sm:$0xff]  }
  0xca   :  { %1691 = vmatprep.mubr.bf16.mxu1 %v4221_v39  ;;  %v3749_v39 = vld [vmem:[#allocation8 + $0x5ec] ss:$16 sps:$4 sm:$0xff]  }
  0xcb   :  { %1713 = vmatpush1.bf16.msra.mxu0 %v3723_v62  ;;  %v4289_v62 = vld [vmem:[#allocation10 + $0xc8] ss:$16 sps:$4 sm:$0xff]  }
  0xcc   :  { %1786 = vmatpush1.bf16.msra.mxu1 %v3726_v63  ;;  %1714 = vmatprep.subr.bf16.mxu0 %v3734_v49  ;;  %v4293_v63 = vld [vmem:[#allocation10 + $0xa4] ss:$16 sps:$4 sm:$0xff]   ;;  %v4295_v49 = vld [vmem:[#allocation10 + $0xac] ss:$16 sps:$4 sm:$0xff]  }
  0xcd   :  { %1787 = vmatprep.subr.bf16.mxu1 %v3737_v27  ;;  %v4307_v27 = vld [vmem:[#allocation10 + $0x84] ss:$16 sps:$4 sm:$0xff]  }
  0xce   :  { %1619 = vmatmul.mubr.bf16.gmra.mxu0 %v4263_v0 }
  0xcf   :  { %1692 = vmatmul.mubr.bf16.gmra.mxu1 %v4223_v40  ;;  %1715 = vmatpush1.bf16.msra.mxu0 %v3732_v1  ;;  %v3750_v40 = vld [vmem:[#allocation8 + $0x3c8] ss:$16 sps:$4 sm:$0xff]   ;;  %v4309_v1 = vld [vmem:[#allocation10 + $0x8c] ss:$16 sps:$4 sm:$0xff]  }
  0xd0   :  { %1788 = vmatpush1.bf16.msra.mxu1 %v3735_v2  ;;  %1716 = vmatprep.subr.bf16.mxu0 %v3740_v3  ;;  %v4321_v2 = vld [vmem:[#allocation10 + $0x64] ss:$16 sps:$4 sm:$0xff]   ;;  %v4323_v3 = vld [vmem:[#allocation10 + $0x6c] ss:$16 sps:$4 sm:$0xff]  }
  0xd1   :  { %1789 = vmatprep.subr.bf16.mxu1 %v3743_v28  ;;  %1734 = vmatprep.mubr.bf16.mxu0 %v4187_v51  ;;  %v3756_v51 = vld [vmem:[#allocation8 + $0x3a8] ss:$16 sps:$4 sm:$0xff]   ;;  %v4335_v28 = vld [vmem:[#allocation10 + $0x44] ss:$16 sps:$4 sm:$0xff]  }
  0xd2   :  { %1807 = vmatprep.mubr.bf16.mxu1 %v4236_v57  ;;  %v3759_v57 = vld [vmem:[#allocation8 + $0x5a8] ss:$16 sps:$4 sm:$0xff]  }
  0xd3   :  { %1717 = vmatpush1.bf16.msra.mxu0 %v3738_v6  ;;  %v4337_v6 = vld [vmem:[#allocation10 + $0x4c] ss:$16 sps:$4 sm:$0xff]  }
  0xd4   :  { %1790 = vmatpush1.bf16.msra.mxu1 %v3741_v7  ;;  %1718 = vmatprep.subr.bf16.mxu0 %v3746_v8  ;;  %v4349_v7 = vld [vmem:[#allocation10 + $0x24] ss:$16 sps:$4 sm:$0xff]   ;;  %v4351_v8 = vld [vmem:[#allocation10 + $0x2c] ss:$16 sps:$4 sm:$0xff]  }
  0xd5   :  { %1791 = vmatprep.subr.bf16.mxu1 %v3749_v39  ;;  %4914 = vst [vmem:[#allocation22_spill] sm:$0xff] %v4349_v7  ;;  %4915 = vst [vmem:[#allocation23_spill] sm:$0xff] %v4351_v8  ;;  %v4363_v39 = vld [vmem:[#allocation10 + $0x4] ss:$16 sps:$4 sm:$0xff]  }
  0xd6   :  { %4918 = vst [vmem:[#allocation26_spill] sm:$0xff] %v4363_v39 }
  0xd7   :  { %1719 = vmatpush2.bf16.msra.mxu0 %v3744_v9  ;;  %v4365_v9 = vld [vmem:[#allocation10 + $0xc] ss:$16 sps:$4 sm:$0xff]  }
  0xd8   :  { %1792 = vmatpush2.bf16.msra.mxu1 %v3747_v10  ;;  %1720 = vmatprep.subr.bf16.mxu0 %v3752_v11  ;;  %4919 = vst [vmem:[#allocation27_spill] sm:$0xff] %v4365_v9 }
  0xd9   :  { %1793 = vmatprep.subr.bf16.mxu1 %v3755_v12  ;;  %v4417_v12 = vld [vmem:[%s4878_s3] sm:$0xf] }
  0xdb   :  { %1721 = vmatpush2.bf16.msra.mxu0 %v3750_v40 }
  0xdc   :  { %1794 = vmatpush2.bf16.msra.mxu1 %v3753_v13  ;;  %1722 = vmatprep.subr.bf16.mxu0 %v3758_v14 }
  0xdd   :  { %1795 = vmatprep.subr.bf16.mxu1 %v3761_v18 }
  0xdf   :  { %1723 = vmatpush2.bf16.msra.mxu0 %v3756_v51 }
  0xe0   :  { %1796 = vmatpush2.bf16.msra.mxu1 %v3759_v57  ;;  %1724 = vmatprep.subr.bf16.mxu0 %v3764_v19 }
  0xe1   :  { %1797 = vmatprep.subr.bf16.mxu1 %v3767_v20 }
  0xe3   :  { %1725 = vmatpush2.bf16.msra.mxu0 %v3762_v22 }
  0xe4   :  { %1798 = vmatpush2.bf16.msra.mxu1 %v3765_v23  ;;  %1726 = vmatprep.subr.bf16.mxu0 %v3770_v24 }
  0xe5   :  { %1799 = vmatprep.subr.bf16.mxu1 %v3773_v25 }
  0xe7   :  { %1727 = vmatpush2.bf16.msra.mxu0 %v3768_v26 }
  0xe8   :  { %1800 = vmatpush2.bf16.msra.mxu1 %v3771_v31  ;;  %1728 = vmatprep.subr.bf16.mxu0 %v3776_v32 }
  0xe9   :  { %1801 = vmatprep.subr.bf16.mxu1 %v3779_v34 }
  0xeb   :  { %1729 = vmatpush2.bf16.msra.mxu0 %v3774_v35 }
  0xec   :  { %1802 = vmatpush2.bf16.msra.mxu1 %v3777_v37  ;;  %1730 = vmatprep.subr.bf16.mxu0 %v3782_v38 }
  0xed   :  { %1803 = vmatprep.subr.bf16.mxu1 %v3785_v42 }
  0xef   :  { %1731 = vmatpush2.bf16.msra.mxu0 %v3780_v43 }
  0xf0   :  { %1804 = vmatpush2.bf16.msra.mxu1 %v3783_v46  ;;  %1732 = vmatprep.subr.bf16.mxu0 %v3788_v47 }
  0xf1   :  { %1805 = vmatprep.subr.bf16.mxu1 %v3791_v50 }
  0xf3   :  { %1733 = vmatpush2.bf16.msra.mxu0 %v3786_v4 }
  0xf4   :  { %1806 = vmatpush2.bf16.msra.mxu1 %v3789_v53  ;;  %2078 = vmatprep.subr.bf16.mxu0 %v4269_v54 }
  0xf5   :  { %2119 = vmatprep.subr.bf16.mxu1 %v4271_v55 }
  0xf6   :  { %1735 = vmatmul.mubr.bf16.vlgmr.msra.gmra.mxu0 %v4193_v5  ;;  %v4301_v5 = vld [vmem:[#allocation10 + $0xa0] ss:$16 sps:$4 sm:$0xff]  }
  0xf7   :  { %1808 = vmatmul.mubr.bf16.vlgmr.msra.gmra.mxu1 %v4239_v30  ;;  %2079 = vmatpush1.bf16.msra.mxu0 %v4273_v15  ;;  %v4303_v30 = vld [vmem:[#allocation10 + $0xa8] ss:$16 sps:$4 sm:$0xff]  }
  0xf8   :  { %2120 = vmatpush1.bf16.msra.mxu1 %v4275_v58  ;;  %2080 = vmatprep.subr.bf16.mxu0 %v4279_v59 }
  0xf9   :  { %2121 = vmatprep.subr.bf16.mxu1 %v4281_v60  ;;  %1744 = vmatprep.mubr.bf16.mxu0 %v4201_v17  ;;  %v4315_v17 = vld [vmem:[#allocation10 + $0x80] ss:$16 sps:$4 sm:$0xff]  }
  0xfa   :  { %1817 = vmatprep.mubr.bf16.mxu1 %v4241_v36  ;;  %v4317_v36 = vld [vmem:[#allocation10 + $0x88] ss:$16 sps:$4 sm:$0xff]  }
  0xfb   :  { %2081 = vmatpush1.bf16.msra.mxu0 %v4287_v16 }
  0xfc   :  { %2122 = vmatpush1.bf16.msra.mxu1 %v4289_v62  ;;  %2082 = vmatprep.subr.bf16.mxu0 %v4293_v63 }
  0xfd   :  { %2123 = vmatprep.subr.bf16.mxu1 %v4295_v49 }
  0xfe   :  { %1745 = vmatmul.mubr.bf16.gmra.mxu0 %v4205_v21  ;;  %v4329_v21 = vld [vmem:[#allocation10 + $0x60] ss:$16 sps:$4 sm:$0xff]  }
  0xff   :  { %1818 = vmatmul.mubr.bf16.gmra.mxu1 %v4246_v44  ;;  %2083 = vmatpush1.bf16.msra.mxu0 %v4301_v5  ;;  %v4331_v44 = vld [vmem:[#allocation10 + $0x68] ss:$16 sps:$4 sm:$0xff]  }
 0x100   :  { %2124 = vmatpush1.bf16.msra.mxu1 %v4303_v30  ;;  %2084 = vmatprep.subr.bf16.mxu0 %v4307_v27 }
 0x101   :  { %2125 = vmatprep.subr.bf16.mxu1 %v4309_v1  ;;  %1754 = vmatprep.mubr.bf16.mxu0 %v4213_v29  ;;  %v4343_v29 = vld [vmem:[#allocation10 + $0x40] ss:$16 sps:$4 sm:$0xff]  }
 0x102   :  { %1827 = vmatprep.mubr.bf16.mxu1 %v4249_v52  ;;  %4912 = vst [vmem:[#allocation20_spill] sm:$0xff] %v4343_v29  ;;  %v4345_v52 = vld [vmem:[#allocation10 + $0x48] ss:$16 sps:$4 sm:$0xff]  }
 0x103   :  { %2085 = vmatpush1.bf16.msra.mxu0 %v4315_v17  ;;  %4913 = vst [vmem:[#allocation21_spill] sm:$0xff] %v4345_v52 }
 0x104   :  { %2126 = vmatpush1.bf16.msra.mxu1 %v4317_v36  ;;  %2086 = vmatprep.subr.bf16.mxu0 %v4321_v2 }
 0x105   :  { %2127 = vmatprep.subr.bf16.mxu1 %v4323_v3 }
 0x106   :  { %1755 = vmatmul.mubr.bf16.gmra.mxu0 %v4217_v33  ;;  %v4357_v33 = vld [vmem:[#allocation10 + $0x20] ss:$16 sps:$4 sm:$0xff]  }
 0x107   :  { %1828 = vmatmul.mubr.bf16.gmra.mxu1 %v4254_v56  ;;  %2087 = vmatpush1.bf16.msra.mxu0 %v4329_v21  ;;  %4916 = vst [vmem:[#allocation24_spill] sm:$0xff] %v4357_v33  ;;  %v4359_v56 = vld [vmem:[#allocation10 + $0x28] ss:$16 sps:$4 sm:$0xff]  }
 0x108   :  { %2128 = vmatpush1.bf16.msra.mxu1 %v4331_v44  ;;  %2088 = vmatprep.subr.bf16.mxu0 %v4335_v28  ;;  %4917 = vst [vmem:[#allocation25_spill] sm:$0xff] %v4359_v56 }
 0x109   :  { %2129 = vmatprep.subr.bf16.mxu1 %v4337_v6  ;;  %1764 = vmatprep.mubr.bf16.mxu0 %v4225_v41  ;;  %v4371_v41 = vld [vmem:[#allocation10] ss:$16 sps:$4 sm:$0xff]  }
 0x10a   :  { %1837 = vmatprep.mubr.bf16.mxu1 %v4257_v61  ;;  %4920 = vst [vmem:[#allocation28_spill] sm:$0xff] %v4371_v41  ;;  %v4373_v61 = vld [vmem:[#allocation10 + $0x8] ss:$16 sps:$4 sm:$0xff]  }
 0x10b   :  { %2089 = vmatpush1.bf16.msra.mxu0 %v4343_v29  ;;  %4921 = vst [vmem:[#allocation29_spill] sm:$0xff] %v4373_v61 }
 0x10c   :  { %2130 = vmatpush1.bf16.msra.mxu1 %v4345_v52  ;;  %2090 = vmatprep.subr.bf16.mxu0 %v4349_v7 }
 0x10d   :  { %2131 = vmatprep.subr.bf16.mxu1 %v4351_v8 }
 0x10e   :  { %1765 = vmatmul.mubr.bf16.gmra.mxu0 %v4229_v45  ;;  %v1912_v45 = vld [vmem:[#allocation3] sm:$0xf] }
 0x10f   :  { %1838 = vmatmul.mubr.bf16.gmra.mxu1 %v4263_v0  ;;  %2091 = vmatpush1.bf16.msra.mxu0 %v4357_v33  ;;  %v310_v0 = vlaneseq }
 0x110   :  { %2132 = vmatpush1.bf16.msra.mxu1 %v4359_v56  ;;  %2092 = vmatprep.subr.bf16.mxu0 %v4363_v39 }
 0x111   :  { %2133 = vmatprep.subr.bf16.mxu1 %v4365_v9  ;;  %2110 = vmatprep.mubr.bf16.mxu0 %v4884_v48  ;;  %v4405_v10 = vshrl.u32 %v310_v0, 7 }
 0x112   :  { %2151 = vmatprep.mubr.bf16.mxu1 %v4884_v48 }
 0x113   :  { %2093 = vmatpush1.bf16.msra.mxu0 %v4371_v41  ;;  %v312_v11 = vsub.s32 0, %v4405_v10  ;;  %v316_v40 = vsub.s32 1, %v4405_v10 }
 0x114   :  { %2134 = vmatpush1.bf16.msra.mxu1 %v4373_v61  ;;  %2193 = vmatprep.subr.bf16.mxu0 %v4269_v54 }
 0x115   :  { %2234 = vmatprep.subr.bf16.mxu1 %v4271_v55  ;;  %v313_v13 = vrot.slane %v4417_v12, %v312_v11  ;;  %v317_v14 = vrot.slane %v4417_v12, %v316_v40 }
 0x116   :  { %2111 = vmatmul.mubr.bf16.vlgmr.msra.gmra.mxu0 %v1912_v45 }
 0x117   :  { %2152 = vmatmul.mubr.bf16.vlgmr.msra.gmra.mxu1 %v1912_v45  ;;  %2194 = vmatpush1.bf16.msra.mxu0 %v4273_v15 }
 0x118   :  { %2235 = vmatpush1.bf16.msra.mxu1 %v4275_v58  ;;  %2195 = vmatprep.subr.bf16.mxu0 %v4279_v59 }
 0x119   :  { %2236 = vmatprep.subr.bf16.mxu1 %v4281_v60  ;;  %2225 = vmatprep.mubr.bf16.mxu0 %v4884_v48 }
 0x11a   :  { %2266 = vmatprep.mubr.bf16.mxu1 %v4884_v48 }
 0x11b   :  { %2196 = vmatpush1.bf16.msra.mxu0 %v4287_v16 }
 0x11c   :  { %2237 = vmatpush1.bf16.msra.mxu1 %v4289_v62  ;;  %2197 = vmatprep.subr.bf16.mxu0 %v4293_v63 }
 0x11d   :  { %2238 = vmatprep.subr.bf16.mxu1 %v4295_v49 }
 0x11f   :  { %2198 = vmatpush1.bf16.msra.mxu0 %v4301_v5 }
 0x120   :  { %2239 = vmatpush1.bf16.msra.mxu1 %v4303_v30  ;;  %2199 = vmatprep.subr.bf16.mxu0 %v4307_v27 }
 0x121   :  { %2240 = vmatprep.subr.bf16.mxu1 %v4309_v1 }
 0x123   :  { %2200 = vmatpush1.bf16.msra.mxu0 %v4315_v17 }
 0x124   :  { %2241 = vmatpush1.bf16.msra.mxu1 %v4317_v36  ;;  %2201 = vmatprep.subr.bf16.mxu0 %v4321_v2 }
 0x125   :  { %2242 = vmatprep.subr.bf16.mxu1 %v4323_v3 }
 0x127   :  { %2202 = vmatpush1.bf16.msra.mxu0 %v4329_v21 }
 0x128   :  { %2243 = vmatpush1.bf16.msra.mxu1 %v4331_v44  ;;  %2203 = vmatprep.subr.bf16.mxu0 %v4335_v28 }
 0x129   :  { %2244 = vmatprep.subr.bf16.mxu1 %v4337_v6 }
 0x12b   :  { %2204 = vmatpush1.bf16.msra.mxu0 %v4343_v29 }
 0x12c   :  { %2245 = vmatpush1.bf16.msra.mxu1 %v4345_v52  ;;  %2205 = vmatprep.subr.bf16.mxu0 %v4349_v7 }
 0x12d   :  { %2246 = vmatprep.subr.bf16.mxu1 %v4351_v8 }
 0x12f   :  { %2206 = vmatpush1.bf16.msra.mxu0 %v4357_v33 }
 0x130   :  { %2247 = vmatpush1.bf16.msra.mxu1 %v4359_v56  ;;  %2207 = vmatprep.subr.bf16.mxu0 %v4363_v39 }
 0x131   :  { %2248 = vmatprep.subr.bf16.mxu1 %v4365_v9 }
 0x133   :  { %2208 = vmatpush1.bf16.msra.mxu0 %v4371_v41 }
 0x134   :  { %2249 = vmatpush1.bf16.msra.mxu1 %v4373_v61  ;;  %2308 = vmatprep.subr.bf16.mxu0 %v4269_v54 }
 0x135   :  { %2349 = vmatprep.subr.bf16.mxu1 %v4271_v55 }
 0x136   :  { %v1444_v18 = vpop.f32.mrf.mxu0 }
 0x137   :  { %v1517_v51 = vpop.f32.mrf.mxu1  ;;  %v1445_v57 = vadd.f32 %v1444_v18, %v313_v13 }
 0x138   :  { %v1446_v19 = vpop.f32.mrf.mxu0 }
 0x139   :  { %v1519_v20 = vpop.f32.mrf.mxu1  ;;  %v1447_v22 = vadd.f32 %v1446_v19, %v317_v14  ;;  %v1518_v23 = vadd.f32 %v1517_v51, %v1445_v57 }
 0x13a   :  { %v1448_v24 = vpop.f32.mrf.mxu0 }
 0x13b   :  { %v1521_v25 = vpop.f32.mrf.mxu1  ;;  %v1449_v26 = vadd.f32 %v1448_v24, %v313_v13  ;;  %v4428_v31 = vadd.f32 %v1519_v20, %v1447_v22 }
 0x13c   :  { %v1450_v32 = vpop.f32.mrf.mxu0 }
 0x13d   :  { %v1523_v34 = vpop.f32.mrf.mxu1  ;;  %v1451_v35 = vadd.f32 %v1450_v32, %v317_v14  ;;  %v1522_v37 = vadd.f32 %v1521_v25, %v1449_v26 }
 0x13e   :  { %v1454_v38 = vpop.f32.mrf.mxu0 }
 0x13f   :  { %v4430_v42 = vadd.f32 %v1523_v34, %v1451_v35  ;;  %v1455_v43 = vadd.f32 %v1454_v38, %v313_v13  ;;  %v1527_v50 = vpop.f32.mrf.mxu1 }
 0x140   :  { %v1456_v46 = vpop.f32.mrf.mxu0 }
 0x141   :  { %v1457_v47 = vadd.f32 %v1456_v46, %v317_v14  ;;  %v1528_v4 = vadd.f32 %v1527_v50, %v1455_v43  ;;  %v1529_v0 = vpop.f32.mrf.mxu1 }
 0x142   :  { %v1458_v53 = vpop.f32.mrf.mxu0 }
 0x143   :  { %v1459_v45 = vadd.f32 %v1458_v53, %v313_v13  ;;  %v1530_v11 = vadd.f32 %v1529_v0, %v1457_v47  ;;  %v1531_v51 = vpop.f32.mrf.mxu1 }
 0x144   :  { %v1460_v40 = vpop.f32.mrf.mxu0 }
 0x145   :  { %v1461_v18 = vadd.f32 %v1460_v40, %v317_v14  ;;  %v1532_v57 = vadd.f32 %v1531_v51, %v1459_v45  ;;  %v1533_v22 = vpop.f32.mrf.mxu1 }
 0x146   :  { %v1464_v19 = vpop.f32.mrf.mxu0 }
 0x147   :  { %v1465_v20 = vadd.f32 %v1464_v19, %v313_v13  ;;  %v1534_v24 = vadd.f32 %v1533_v22, %v1461_v18  ;;  %v1537_v32 = vpop.f32.mrf.mxu1 }
 0x148   :  { %v1466_v25 = vpop.f32.mrf.mxu0 }
 0x149   :  { %v1467_v26 = vadd.f32 %v1466_v25, %v317_v14  ;;  %v1538_v34 = vadd.f32 %v1537_v32, %v1465_v20  ;;  %v1539_v46 = vpop.f32.mrf.mxu1 }
 0x14a   :  { %v1468_v35 = vpop.f32.mrf.mxu0 }
 0x14b   :  { %v1469_v38 = vadd.f32 %v1468_v35, %v313_v13  ;;  %v1540_v43 = vadd.f32 %v1539_v46, %v1467_v26  ;;  %v1541_v48 = vpop.f32.mrf.mxu1 }
 0x14c   :  { %v1470_v50 = vpop.f32.mrf.mxu0 }
 0x14d   :  { %v1471_v53 = vadd.f32 %v1470_v50, %v317_v14  ;;  %v1542_v47 = vadd.f32 %v1541_v48, %v1469_v38  ;;  %v1543_v55 = vpop.f32.mrf.mxu1  ;;  %v320_v48 = vsub.s32 2, %v4405_v10  ;;  %v324_v38 = vsub.s32 3, %v4405_v10 }
 0x14e   :  { %v1474_v0 = vpop.f32.mrf.mxu0 }
 0x14f   :  { %v1475_v40 = vadd.f32 %v1474_v0, %v313_v13  ;;  %v1544_v45 = vadd.f32 %v1543_v55, %v1471_v53  ;;  %v1547_v54 = vpop.f32.mrf.mxu1 }
 0x150   :  { %v1476_v51 = vpop.f32.mrf.mxu0 }
 0x151   :  { %v1477_v19 = vadd.f32 %v1476_v51, %v317_v14  ;;  %v1548_v18 = vadd.f32 %v1547_v54, %v1475_v40  ;;  %v1549_v61 = vpop.f32.mrf.mxu1  ;;  %v4441_v54 = vrot.slane %v4417_v12, %v320_v48 }
 0x152   :  { %v1478_v22 = vpop.f32.mrf.mxu0 }
 0x153   :  { %v1479_v25 = vadd.f32 %v1478_v22, %v313_v13  ;;  %v1550_v20 = vadd.f32 %v1549_v61, %v1477_v19  ;;  %v1551_v41 = vpop.f32.mrf.mxu1 }
 0x154   :  { %v1480_v32 = vpop.f32.mrf.mxu0 }
 0x155   :  { %v1481_v35 = vadd.f32 %v1480_v32, %v317_v14  ;;  %v1552_v26 = vadd.f32 %v1551_v41, %v1479_v25  ;;  %v1553_v46 = vpop.f32.mrf.mxu1  ;;  %v4448_v41 = vrot.slane %v4417_v12, %v324_v38 }
 0x157   :  { %v4432_v50 = vadd.f32 %v1553_v46, %v1481_v35 }
 0x176   :  { %v1590_v55 = vpop.f32.mrf.mxu0 }
 0x177   :  { %v4436_v53 = vpop.f32.mrf.mxu1  ;;  %v4438_v0 = vadd.f32 %v1590_v55, %v1518_v23 }
 0x178   :  { %v4443_v61 = vpop.f32.mrf.mxu0 }
 0x179   :  { %v4445_v13 = vpop.f32.mrf.mxu1 }
 0x17a   :  { %v1594_v14 = vpop.f32.mrf.mxu0 }
 0x17b   :  { %v1667_v40 = vpop.f32.mrf.mxu1  ;;  %v4450_v51 = vadd.f32 %v1594_v14, %v1522_v37 }
 0x17c   :  { %v1668_v10 = vadd.f32 %v1667_v40, %v4441_v54  ;;  %v1596_v19 = vpop.f32.mrf.mxu0 }
 0x17d   :  { %4922 = vst [vmem:[#allocation30_spill] sm:$0xff] %v4450_v51  ;;  %v1669_v22 = vpop.f32.mrf.mxu1  ;;  %v4454_v23 = vadd.f32 %v1596_v19, %v4430_v42 }
 0x17e   :  { %v1670_v25 = vadd.f32 %v1669_v22, %v4448_v41  ;;  %v1600_v32 = vpop.f32.mrf.mxu0 }
 0x17f   :  { %4923 = vst [vmem:[#allocation31_spill] sm:$0xff] %v4454_v23  ;;  %v1673_v35 = vpop.f32.mrf.mxu1  ;;  %v4457_v46 = vadd.f32 %v1600_v32, %v1528_v4 }
 0x180   :  { %v1674_v12 = vadd.f32 %v1673_v35, %v4441_v54  ;;  %v1602_v48 = vpop.f32.mrf.mxu0 }
 0x181   :  { %4924 = vst [vmem:[#allocation32_spill] sm:$0xff] %v4457_v46  ;;  %v1675_v38 = vpop.f32.mrf.mxu1  ;;  %v4460_v55 = vadd.f32 %v1602_v48, %v1530_v11 }
 0x182   :  { %v1676_v37 = vadd.f32 %v1675_v38, %v4448_v41  ;;  %v1604_v14 = vpop.f32.mrf.mxu0 }
 0x183   :  { %4925 = vst [vmem:[#allocation33_spill] sm:$0xff] %v4460_v55  ;;  %v1677_v40 = vpop.f32.mrf.mxu1  ;;  %v4463_v51 = vadd.f32 %v1604_v14, %v1532_v57 }
 0x184   :  { %v1678_v42 = vadd.f32 %v1677_v40, %v4441_v54  ;;  %v1606_v19 = vpop.f32.mrf.mxu0 }
 0x185   :  { %4926 = vst [vmem:[#allocation34_spill] sm:$0xff] %v4463_v51  ;;  %v1679_v22 = vpop.f32.mrf.mxu1  ;;  %v4466_v23 = vadd.f32 %v1606_v19, %v1534_v24 }
 0x186   :  { %v1680_v4 = vadd.f32 %v1679_v22, %v4448_v41  ;;  %v1610_v32 = vpop.f32.mrf.mxu0 }
 0x187   :  { %4927 = vst [vmem:[#allocation35_spill] sm:$0xff] %v4466_v23  ;;  %v1683_v35 = vpop.f32.mrf.mxu1  ;;  %v4469_v46 = vadd.f32 %v1610_v32, %v1538_v34 }
 0x188   :  { %v1684_v11 = vadd.f32 %v1683_v35, %v4441_v54  ;;  %v1612_v48 = vpop.f32.mrf.mxu0 }
 0x189   :  { %4928 = vst [vmem:[#allocation36_spill] sm:$0xff] %v4469_v46  ;;  %v1685_v38 = vpop.f32.mrf.mxu1  ;;  %v4472_v55 = vadd.f32 %v1612_v48, %v1540_v43 }
 0x18a   :  { %v1686_v57 = vadd.f32 %v1685_v38, %v4448_v41  ;;  %v1614_v14 = vpop.f32.mrf.mxu0 }
 0x18b   :  { %4929 = vst [vmem:[#allocation37_spill] sm:$0xff] %v4472_v55  ;;  %v1687_v40 = vpop.f32.mrf.mxu1  ;;  %v4475_v51 = vadd.f32 %v1614_v14, %v1542_v47 }
 0x18c   :  { %v1688_v24 = vadd.f32 %v1687_v40, %v4441_v54  ;;  %v1616_v19 = vpop.f32.mrf.mxu0 }
 0x18d   :  { %4930 = vst [vmem:[#allocation38_spill] sm:$0xff] %v4475_v51  ;;  %v1689_v22 = vpop.f32.mrf.mxu1  ;;  %v4478_v23 = vadd.f32 %v1616_v19, %v1544_v45 }
 0x18e   :  { %v1690_v34 = vadd.f32 %v1689_v22, %v4448_v41  ;;  %v1620_v32 = vpop.f32.mrf.mxu0 }
 0x18f   :  { %4931 = vst [vmem:[#allocation39_spill] sm:$0xff] %v4478_v23  ;;  %v1693_v35 = vpop.f32.mrf.mxu1  ;;  %v4481_v46 = vadd.f32 %v1620_v32, %v1548_v18 }
 0x190   :  { %v1694_v43 = vadd.f32 %v1693_v35, %v4441_v54  ;;  %v1622_v48 = vpop.f32.mrf.mxu0 }
 0x191   :  { %4932 = vst [vmem:[#allocation40_spill] sm:$0xff] %v4481_v46  ;;  %v1695_v38 = vpop.f32.mrf.mxu1  ;;  %v4484_v55 = vadd.f32 %v1622_v48, %v1550_v20 }
 0x192   :  { %v1696_v47 = vadd.f32 %v1695_v38, %v4448_v41  ;;  %v1624_v14 = vpop.f32.mrf.mxu0 }
 0x193   :  { %4933 = vst [vmem:[#allocation41_spill] sm:$0xff] %v4484_v55  ;;  %v1697_v40 = vpop.f32.mrf.mxu1  ;;  %v4487_v51 = vadd.f32 %v1624_v14, %v1552_v26 }
 0x194   :  { %v1698_v45 = vadd.f32 %v1697_v40, %v4441_v54  ;;  %v1626_v19 = vpop.f32.mrf.mxu0 }
 0x195   :  { %4934 = vst [vmem:[#allocation42_spill] sm:$0xff] %v4487_v51  ;;  %v1699_v22 = vpop.f32.mrf.mxu1  ;;  %v4491_v23 = vadd.f32 %v1626_v19, %v4432_v50 }
 0x196   :  { %v1700_v18 = vadd.f32 %v1699_v22, %v4448_v41 }
 0x197   :  { %4935 = vst [vmem:[#allocation43_spill] sm:$0xff] %v4491_v23 }
 0x1b6   :  { %v4494_v32 = vpop.f32.mrf.mxu0 }
 0x1b7   :  { %v4496_v35 = vpop.f32.mrf.mxu1 }
 0x1b8   :  { %v4498_v20 = vpop.f32.mrf.mxu0 }
 0x1b9   :  { %v4500_v48 = vpop.f32.mrf.mxu1 }
 0x1ba   :  { %v1740_v38 = vpop.f32.mrf.mxu0 }
 0x1bb   :  { %v1813_v26 = vpop.f32.mrf.mxu1  ;;  %v1741_v14 = vadd.f32 %v1740_v38, %v1668_v10 }
 0x1bc   :  { %v1742_v51 = vpop.f32.mrf.mxu0 }
 0x1bd   :  { %v1815_v40 = vpop.f32.mrf.mxu1  ;;  %v4502_v55 = vadd.f32 %v1813_v26, %v1741_v14  ;;  %v1743_v46 = vadd.f32 %v1742_v51, %v1670_v25 }
 0x1be   :  { %v1746_v50 = vpop.f32.mrf.mxu0 }
 0x1bf   :  { %v1819_v19 = vpop.f32.mrf.mxu1  ;;  %v4504_v23 = vadd.f32 %v1815_v40, %v1743_v46  ;;  %v1747_v22 = vadd.f32 %v1746_v50, %v1674_v12 }
 0x1c0   :  { %v1748_v9 = vpop.f32.mrf.mxu0 }
 0x1c1   :  { %v1821_v39 = vpop.f32.mrf.mxu1  ;;  %v4506_v56 = vadd.f32 %v1819_v19, %v1747_v22  ;;  %v1749_v33 = vadd.f32 %v1748_v9, %v1676_v37 }
 0x1c2   :  { %v1750_v8 = vpop.f32.mrf.mxu0 }
 0x1c3   :  { %v1823_v7 = vpop.f32.mrf.mxu1  ;;  %v4508_v52 = vadd.f32 %v1821_v39, %v1749_v33  ;;  %v1751_v10 = vadd.f32 %v1750_v8, %v1678_v42 }
 0x1c4   :  { %v1752_v38 = vpop.f32.mrf.mxu0 }
 0x1c5   :  { %v1825_v29 = vpop.f32.mrf.mxu1  ;;  %v4510_v26 = vadd.f32 %v1823_v7, %v1751_v10  ;;  %v1753_v51 = vadd.f32 %v1752_v38, %v1680_v4 }
 0x1c6   :  { %v1756_v25 = vpop.f32.mrf.mxu0 }
 0x1c7   :  { %v1829_v14 = vpop.f32.mrf.mxu1  ;;  %v4512_v46 = vadd.f32 %v1825_v29, %v1753_v51  ;;  %v1757_v12 = vadd.f32 %v1756_v25, %v1684_v11 }
 0x1c8   :  { %v1758_v40 = vpop.f32.mrf.mxu0 }
 0x1c9   :  { %v1831_v50 = vpop.f32.mrf.mxu1  ;;  %v4514_v19 = vadd.f32 %v1829_v14, %v1757_v12  ;;  %v1759_v9 = vadd.f32 %v1758_v40, %v1686_v57 }
 0x1ca   :  { %v1760_v37 = vpop.f32.mrf.mxu0 }
 0x1cb   :  { %v1833_v22 = vpop.f32.mrf.mxu1  ;;  %v4516_v33 = vadd.f32 %v1831_v50, %v1759_v9  ;;  %v1761_v8 = vadd.f32 %v1760_v37, %v1688_v24 }
 0x1cc   :  { %v1762_v39 = vpop.f32.mrf.mxu0 }
 0x1cd   :  { %v1835_v42 = vpop.f32.mrf.mxu1  ;;  %v4518_v7 = vadd.f32 %v1833_v22, %v1761_v8  ;;  %v1763_v4 = vadd.f32 %v1762_v39, %v1690_v34 }
 0x1ce   :  { %v1766_v10 = vpop.f32.mrf.mxu0 }
 0x1cf   :  { %v1839_v38 = vpop.f32.mrf.mxu1  ;;  %v4520_v29 = vadd.f32 %v1835_v42, %v1763_v4  ;;  %v1767_v11 = vadd.f32 %v1766_v10, %v1694_v43  ;;  %v1593_v43 = vadd.f32 %v4443_v61, %v4428_v31  ;;  %v1666_v31 = vadd.f32 %v4445_v13, %v4448_v41 }
 0x1d0   :  { %v1768_v51 = vpop.f32.mrf.mxu0 }
 0x1d1   :  { %v1841_v25 = vpop.f32.mrf.mxu1  ;;  %v4522_v14 = vadd.f32 %v1839_v38, %v1767_v11  ;;  %v1769_v57 = vadd.f32 %v1768_v51, %v1696_v47  ;;  %v1664_v38 = vadd.f32 %v4436_v53, %v4441_v54  ;;  %v1739_v61 = vadd.f32 %v4498_v20, %v1666_v31  ;;  %v4946_v31 = vld [vmem:[#allocation26_spill] sm:$0xff] }
 0x1d2   :  { %v1770_v12 = vpop.f32.mrf.mxu0 }
 0x1d3   :  { %v1843_v40 = vpop.f32.mrf.mxu1  ;;  %v4524_v50 = vadd.f32 %v1841_v25, %v1769_v57  ;;  %v1771_v24 = vadd.f32 %v1770_v12, %v1698_v45  ;;  %v1812_v53 = vadd.f32 %v4500_v48, %v1739_v61  ;;  %v4948_v61 = vld [vmem:[#allocation28_spill] sm:$0xff] }
 0x1d4   :  { %v1772_v9 = vpop.f32.mrf.mxu0 }
 0x1d5   :  { %4936 = vst [vmem:[#allocation44_spill] sm:$0xff] %v4524_v50  ;;  %v1845_v37 = vpop.f32.mrf.mxu1  ;;  %v4526_v22 = vadd.f32 %v1843_v40, %v1771_v24  ;;  %v1773_v34 = vadd.f32 %v1772_v9, %v1700_v18  ;;  %v1737_v18 = vadd.f32 %v4494_v32, %v1664_v38 }
 0x1d6   :  { %v2112_v8 = vpop.f32.mrf.mxu0 }
 0x1d7   :  { %4937 = vst [vmem:[#allocation45_spill] sm:$0xff] %v4526_v22  ;;  %v2153_v39 = vpop.f32.mrf.mxu1  ;;  %v4530_v42 = vadd.f32 %v1845_v37, %v1773_v34  ;;  %v2160_v4 = vadd.f32 %v2112_v8, %v4438_v0  ;;  %v1810_v0 = vadd.f32 %v4496_v35, %v1737_v18  ;;  %v4942_v18 = vld [vmem:[#allocation22_spill] sm:$0xff] }
 0x1d8   :  { %v2114_v47 = vpop.f32.mrf.mxu0 }
 0x1d9   :  { %4938 = vst [vmem:[#allocation46_spill] sm:$0xff] %v4530_v42  ;;  %v2155_v10 = vpop.f32.mrf.mxu1  ;;  %v3375_v45 = vmul.f32 -1.442695, %v2160_v4  ;;  %v2161_v11 = vadd.f32 %v2114_v47, %v1593_v43  ;;  %v2162_v24 = vadd.f32 %v2153_v39, %v1810_v0  ;;  %v4947_v0 = vld [vmem:[#allocation27_spill] sm:$0xff] }
 0x1da   :  { %v2116_v51 = vpop.f32.mrf.mxu0  ;;  %v2163_v9 = vadd.f32 %v2155_v10, %v1812_v53  ;;  %v4950_v53 = vld [vmem:[#allocation18_spill] sm:$0xff] }
 0x1db   :  { %v2157_v25 = vpop.f32.mrf.mxu1  ;;  %3840 = vpow2.f32 %v3375_v45  ;;  %v3376_v57 = vmul.f32 -1.442695, %v2161_v11  ;;  %v3377_v54 = vmul.f32 -1.442695, %v2162_v24  ;;  %v4939_v11 = vmov 0   ;;  %v4940_v51 = vld [vmem:[#allocation20_spill] sm:$0xff] }
 0x1dc   :  { %v2117_v12 = vpop.f32.mrf.mxu0  ;;  %v4941_v25 = vld [vmem:[#allocation21_spill] sm:$0xff] }
 0x1dd   :  { %v2158_v40 = vpop.f32.mrf.mxu1  ;;  %3842 = vpow2.f32 %v3376_v57  ;;  %v4943_v57 = vld [vmem:[#allocation23_spill] sm:$0xff]  ;;  %v4944_v12 = vld [vmem:[#allocation24_spill] sm:$0xff]  ;;  %v4949_v24 = vld [vmem:[#allocation29_spill] sm:$0xff] }
 0x1de   :  { %3844 = vpow2.f32 %v3377_v54  ;;  %v4945_v40 = vld [vmem:[#allocation25_spill] sm:$0xff]  ;;  %v4951_v54 = vld [vmem:[#allocation19_spill] sm:$0xff] }
 0x1df   :  { %3846 = vtanh.f32 %v2163_v9 }
 0x1e8   :  { %v3841_v37 = vpop.eup %3840 }
 0x1e9   :  { %v2173_v34 = vadd.f32 1.0, %v3841_v37 }
 0x1ea   :  { %v3843_v32 = vpop.eup %3842 }
 0x1eb   :  { %3848 = vrcp.f32 %v2173_v34  ;;  %v2174_v8 = vadd.f32 1.0, %v3843_v32  ;;  %v3845_v43 = vpop.eup %3844  ;;  %v4952_v34 = vld [vmem:[#allocation30_spill] sm:$0xff] }
 0x1ec   :  { %v3847_v4 = vpop.eup %3846  ;;  %v2175_v47 = vadd.f32 1.0, %v3845_v43 }
 0x1ed   :  { %3850 = vrcp.f32 %v2174_v8 }
 0x1ee   :  { %3852 = vrcp.f32 %v2175_v47 }
 0x1f8   :  { %v3849_v13 = vpop.eup %3848 }
 0x1f9   :  { %v2184_v41 = vmul.f32 %v3849_v13, %v3847_v4  ;;  %v4953_v13 = vld [vmem:[#allocation31_spill] sm:$0xff] }
 0x1fa   :  { %v3851_v35 = vpop.eup %3850 }
 0x1fb   :  { %v2183_v20 = vmul.f32 0.0, %v3851_v35  ;;  %v3853_v48 = vpop.eup %3852 }
 0x1fd   :  { %v4541_v39 = vadd.f32 %v2184_v41, %v2183_v20 }
 0x1ff   :  { %3854 = vtanh.f32 %v4541_v39 }
 0x20c   :  { %v3855_v10 = vpop.eup %3854 }
 0x20d   :  { %v2187_v38 = vmul.f32 %v3855_v10, %v3853_v48 }
 0x20f   :  { %v2188_v45 = vpack.c.bf16 %v2187_v38, %v2187_v38 }
 0x211   :  { %2226 = vmatmul.mubr.bf16.vlgmr.msra.gmra.mxu0 %v2188_v45  ;;  %2267 = vmatmul.mubr.bf16.vlgmr.msra.gmra.mxu1 %v2188_v45 }
 0x212   :  { %2309 = vmatpush1.bf16.msra.mxu0 %v4273_v15  ;;  %2350 = vmatpush1.bf16.msra.mxu1 %v4275_v58 }
 0x213   :  { %2310 = vmatprep.subr.bf16.mxu0 %v4279_v59  ;;  %2351 = vmatprep.subr.bf16.mxu1 %v4281_v60 }
 0x214   :  { %2340 = vmatprep.mubr.bf16.mxu0 %v4939_v11  ;;  %2381 = vmatprep.mubr.bf16.mxu1 %v4939_v11 }
 0x216   :  { %2311 = vmatpush1.bf16.msra.mxu0 %v4287_v16  ;;  %2352 = vmatpush1.bf16.msra.mxu1 %v4289_v62 }
 0x217   :  { %2312 = vmatprep.subr.bf16.mxu0 %v4293_v63  ;;  %2353 = vmatprep.subr.bf16.mxu1 %v4295_v49 }
 0x21a   :  { %2313 = vmatpush1.bf16.msra.mxu0 %v4301_v5  ;;  %2354 = vmatpush1.bf16.msra.mxu1 %v4303_v30 }
 0x21b   :  { %2314 = vmatprep.subr.bf16.mxu0 %v4307_v27  ;;  %2355 = vmatprep.subr.bf16.mxu1 %v4309_v1 }
 0x21e   :  { %2315 = vmatpush1.bf16.msra.mxu0 %v4315_v17  ;;  %2356 = vmatpush1.bf16.msra.mxu1 %v4317_v36 }
 0x21f   :  { %2316 = vmatprep.subr.bf16.mxu0 %v4321_v2  ;;  %2357 = vmatprep.subr.bf16.mxu1 %v4323_v3 }
 0x222   :  { %2317 = vmatpush1.bf16.msra.mxu0 %v4329_v21  ;;  %2358 = vmatpush1.bf16.msra.mxu1 %v4331_v44 }
 0x223   :  { %2318 = vmatprep.subr.bf16.mxu0 %v4335_v28  ;;  %2359 = vmatprep.subr.bf16.mxu1 %v4337_v6 }
 0x226   :  { %2319 = vmatpush1.bf16.msra.mxu0 %v4940_v51  ;;  %2360 = vmatpush1.bf16.msra.mxu1 %v4941_v25 }
 0x227   :  { %2320 = vmatprep.subr.bf16.mxu0 %v4942_v18  ;;  %2361 = vmatprep.subr.bf16.mxu1 %v4943_v57 }
 0x22a   :  { %2321 = vmatpush1.bf16.msra.mxu0 %v4944_v12  ;;  %2362 = vmatpush1.bf16.msra.mxu1 %v4945_v40 }
 0x22b   :  { %2322 = vmatprep.subr.bf16.mxu0 %v4946_v31  ;;  %2363 = vmatprep.subr.bf16.mxu1 %v4947_v0 }
 0x22e   :  { %2323 = vmatpush1.bf16.msra.mxu0 %v4948_v61  ;;  %2364 = vmatpush1.bf16.msra.mxu1 %v4949_v24 }
 0x22f   :  { %2423 = vmatprep.subr.bf16.mxu0 %v4950_v53  ;;  %2464 = vmatprep.subr.bf16.mxu1 %v4951_v54 }
 0x2d1   :  { %v2227_v9 = vpop.f32.mrf.mxu0  ;;  %v2268_v37 = vpop.f32.mrf.mxu1 }
 0x2d2   :  { %v2275_v32 = vadd.f32 %v2227_v9, %v4952_v34  ;;  %v2277_v38 = vadd.f32 %v2268_v37, %v4502_v55 }
 0x2d3   :  { %v2229_v8 = vpop.f32.mrf.mxu0  ;;  %v2270_v43 = vpop.f32.mrf.mxu1 }
 0x2d4   :  { %v3378_v4 = vmul.f32 -1.442695, %v2275_v32  ;;  %v2276_v41 = vadd.f32 %v2229_v8, %v4953_v13  ;;  %v3380_v45 = vmul.f32 -1.442695, %v2277_v38  ;;  %v2278_v42 = vadd.f32 %v2270_v43, %v4504_v23  ;;  %v4954_v43 = vld [vmem:[#allocation32_spill] sm:$0xff] }
 0x2d5   :  { %v2231_v35 = vpop.f32.mrf.mxu0  ;;  %v2272_v47 = vpop.f32.mrf.mxu1 }
 0x2d6   :  { %3856 = vpow2.f32 %v3378_v4  ;;  %v3379_v20 = vmul.f32 -1.442695, %v2276_v41 }
 0x2d7   :  { %v2232_v48 = vpop.f32.mrf.mxu0  ;;  %v2273_v10 = vpop.f32.mrf.mxu1 }
 0x2d8   :  { %3858 = vpow2.f32 %v3379_v20 }
 0x2d9   :  { %3860 = vpow2.f32 %v3380_v45  ;;  %v4955_v45 = vld [vmem:[#allocation33_spill] sm:$0xff] }
 0x2da   :  { %3862 = vtanh.f32 %v2278_v42 }
 0x2e3   :  { %v3857_v22 = vpop.eup %3856 }
 0x2e4   :  { %v2288_v50 = vadd.f32 1.0, %v3857_v22 }
 0x2e5   :  { %v3859_v9 = vpop.eup %3858 }
 0x2e6   :  { %3864 = vrcp.f32 %v2288_v50  ;;  %v2289_v34 = vadd.f32 1.0, %v3859_v9  ;;  %v3861_v32 = vpop.eup %3860 }
 0x2e7   :  { %v3863_v8 = vpop.eup %3862  ;;  %v2290_v35 = vadd.f32 1.0, %v3861_v32 }
 0x2e8   :  { %3866 = vrcp.f32 %v2289_v34 }
 0x2e9   :  { %3868 = vrcp.f32 %v2290_v35 }
 0x2f3   :  { %v3865_v4 = vpop.eup %3864 }
 0x2f4   :  { %v2299_v13 = vmul.f32 %v3865_v4, %v3863_v8 }
 0x2f5   :  { %v3867_v41 = vpop.eup %3866 }
 0x2f6   :  { %v2298_v47 = vmul.f32 %v3867_v41, %v4541_v39  ;;  %v3869_v23 = vpop.eup %3868 }
 0x2f8   :  { %v4583_v55 = vadd.f32 %v2299_v13, %v2298_v47 }
 0x2fa   :  { %3870 = vtanh.f32 %v4583_v55 }
 0x307   :  { %v3871_v22 = vpop.eup %3870 }
 0x308   :  { %v2302_v37 = vmul.f32 %v3871_v22, %v3869_v23 }
 0x30a   :  { %v2303_v42 = vpack.c.bf16 %v2302_v37, %v2302_v37 }
 0x30c   :  { %2341 = vmatmul.mubr.bf16.vlgmr.msra.gmra.mxu0 %v2303_v42  ;;  %2382 = vmatmul.mubr.bf16.vlgmr.msra.gmra.mxu1 %v2303_v42 }
 0x30d   :  { %2424 = vmatpush1.bf16.msra.mxu0 %v4273_v15  ;;  %2465 = vmatpush1.bf16.msra.mxu1 %v4275_v58 }
 0x30e   :  { %2425 = vmatprep.subr.bf16.mxu0 %v4279_v59  ;;  %2466 = vmatprep.subr.bf16.mxu1 %v4281_v60 }
 0x30f   :  { %2455 = vmatprep.mubr.bf16.mxu0 %v4939_v11  ;;  %2496 = vmatprep.mubr.bf16.mxu1 %v4939_v11 }
 0x311   :  { %2426 = vmatpush1.bf16.msra.mxu0 %v4287_v16  ;;  %2467 = vmatpush1.bf16.msra.mxu1 %v4289_v62 }
 0x312   :  { %2427 = vmatprep.subr.bf16.mxu0 %v4293_v63  ;;  %2468 = vmatprep.subr.bf16.mxu1 %v4295_v49 }
 0x315   :  { %2428 = vmatpush1.bf16.msra.mxu0 %v4301_v5  ;;  %2469 = vmatpush1.bf16.msra.mxu1 %v4303_v30 }
 0x316   :  { %2429 = vmatprep.subr.bf16.mxu0 %v4307_v27  ;;  %2470 = vmatprep.subr.bf16.mxu1 %v4309_v1 }
 0x319   :  { %2430 = vmatpush1.bf16.msra.mxu0 %v4315_v17  ;;  %2471 = vmatpush1.bf16.msra.mxu1 %v4317_v36 }
 0x31a   :  { %2431 = vmatprep.subr.bf16.mxu0 %v4321_v2  ;;  %2472 = vmatprep.subr.bf16.mxu1 %v4323_v3 }
 0x31d   :  { %2432 = vmatpush1.bf16.msra.mxu0 %v4329_v21  ;;  %2473 = vmatpush1.bf16.msra.mxu1 %v4331_v44 }
 0x31e   :  { %2433 = vmatprep.subr.bf16.mxu0 %v4335_v28  ;;  %2474 = vmatprep.subr.bf16.mxu1 %v4337_v6 }
 0x321   :  { %2434 = vmatpush1.bf16.msra.mxu0 %v4940_v51  ;;  %2475 = vmatpush1.bf16.msra.mxu1 %v4941_v25 }
 0x322   :  { %2435 = vmatprep.subr.bf16.mxu0 %v4942_v18  ;;  %2476 = vmatprep.subr.bf16.mxu1 %v4943_v57 }
 0x325   :  { %2436 = vmatpush1.bf16.msra.mxu0 %v4944_v12  ;;  %2477 = vmatpush1.bf16.msra.mxu1 %v4945_v40 }
 0x326   :  { %2437 = vmatprep.subr.bf16.mxu0 %v4946_v31  ;;  %2478 = vmatprep.subr.bf16.mxu1 %v4947_v0 }
 0x329   :  { %2438 = vmatpush1.bf16.msra.mxu0 %v4948_v61  ;;  %2479 = vmatpush1.bf16.msra.mxu1 %v4949_v24 }
 0x32a   :  { %2538 = vmatprep.subr.bf16.mxu0 %v4950_v53  ;;  %2579 = vmatprep.subr.bf16.mxu1 %v4951_v54 }
 0x3cc   :  { %v2342_v50 = vpop.f32.mrf.mxu0  ;;  %v2383_v39 = vpop.f32.mrf.mxu1 }
 0x3cd   :  { %v2390_v20 = vadd.f32 %v2342_v50, %v4954_v43  ;;  %v2392_v53 = vadd.f32 %v2383_v39, %v4506_v56 }
 0x3ce   :  { %v2344_v48 = vpop.f32.mrf.mxu0  ;;  %v2385_v10 = vpop.f32.mrf.mxu1 }
 0x3cf   :  { %v3381_v38 = vmul.f32 -1.442695, %v2390_v20  ;;  %v2391_v9 = vadd.f32 %v2344_v48, %v4955_v45  ;;  %v3383_v41 = vmul.f32 -1.442695, %v2392_v53  ;;  %v2393_v54 = vadd.f32 %v2385_v10, %v4508_v52  ;;  %v4688_v53 = vld [vmem:[#allocation10 + $0xc0] ss:$16 sps:$4 sm:$0xff]  }
 0x3d0   :  { %v2346_v34 = vpop.f32.mrf.mxu0  ;;  %v2387_v32 = vpop.f32.mrf.mxu1 }
 0x3d1   :  { %3872 = vpow2.f32 %v3381_v38  ;;  %v3382_v8 = vmul.f32 -1.442695, %v2391_v9  ;;  %v4674_v32 = vld [vmem:[#allocation10 + $0xe0] ss:$16 sps:$4 sm:$0xff]  }
 0x3d2   :  { %v2347_v4 = vpop.f32.mrf.mxu0  ;;  %v2388_v13 = vpop.f32.mrf.mxu1 }
 0x3d3   :  { %3874 = vpow2.f32 %v3382_v8  ;;  %v4677_v8 = vld [vmem:[#allocation10 + $0xe8] ss:$16 sps:$4 sm:$0xff]   ;;  %v4680_v4 = vld [vmem:[#allocation10 + $0xc4] ss:$16 sps:$4 sm:$0xff]   ;;  %v4683_v13 = vld [vmem:[#allocation10 + $0xcc] ss:$16 sps:$4 sm:$0xff]  }
 0x3d4   :  { %3876 = vpow2.f32 %v3383_v41  ;;  %v4691_v41 = vld [vmem:[#allocation10 + $0xc8] ss:$16 sps:$4 sm:$0xff]  }
 0x3d5   :  { %3878 = vtanh.f32 %v2393_v54  ;;  %v4694_v54 = vld [vmem:[#allocation10 + $0xa4] ss:$16 sps:$4 sm:$0xff]  }
 0x3de   :  { %v3873_v35 = vpop.eup %3872 }
 0x3df   :  { %v2403_v47 = vadd.f32 1.0, %v3873_v35  ;;  %v4697_v35 = vld [vmem:[#allocation10 + $0xac] ss:$16 sps:$4 sm:$0xff]  }
 0x3e0   :  { %v3875_v23 = vpop.eup %3874 }
 0x3e1   :  { %3880 = vrcp.f32 %v2403_v47  ;;  %v2404_v22 = vadd.f32 1.0, %v3875_v23  ;;  %v3877_v37 = vpop.eup %3876  ;;  %v4700_v47 = vld [vmem:[#allocation10 + $0xa0] ss:$16 sps:$4 sm:$0xff]   ;;  %v4703_v23 = vld [vmem:[#allocation10 + $0xa8] ss:$16 sps:$4 sm:$0xff]  }
 0x3e2   :  { %v3879_v42 = vpop.eup %3878  ;;  %v2405_v48 = vadd.f32 1.0, %v3877_v37  ;;  %v4709_v37 = vld [vmem:[#allocation10 + $0x8c] ss:$16 sps:$4 sm:$0xff]  }
 0x3e3   :  { %3882 = vrcp.f32 %v2404_v22  ;;  %v4706_v22 = vld [vmem:[#allocation10 + $0x84] ss:$16 sps:$4 sm:$0xff]  }
 0x3e4   :  { %3884 = vrcp.f32 %v2405_v48  ;;  %v4724_v48 = vld [vmem:[#allocation10 + $0x60] ss:$16 sps:$4 sm:$0xff]  }
 0x3ee   :  { %v3881_v50 = vpop.eup %3880 }
 0x3ef   :  { %v2414_v43 = vmul.f32 %v3881_v50, %v3879_v42  ;;  %v4712_v42 = vld [vmem:[#allocation10 + $0x80] ss:$16 sps:$4 sm:$0xff]   ;;  %v4715_v50 = vld [vmem:[#allocation10 + $0x88] ss:$16 sps:$4 sm:$0xff]  }
 0x3f0   :  { %v3883_v20 = vpop.eup %3882 }
 0x3f1   :  { %v2413_v38 = vmul.f32 %v3883_v20, %v4583_v55  ;;  %v3885_v52 = vpop.eup %3884  ;;  %v4721_v20 = vld [vmem:[#allocation10 + $0x6c] ss:$16 sps:$4 sm:$0xff]  }
 0x3f3   :  { %v4625_v56 = vadd.f32 %v2414_v43, %v2413_v38  ;;  %v4718_v43 = vld [vmem:[#allocation10 + $0x64] ss:$16 sps:$4 sm:$0xff]   ;;  %v4727_v38 = vld [vmem:[#allocation10 + $0x68] ss:$16 sps:$4 sm:$0xff]  }
 0x3f5   :  { %3886 = vtanh.f32 %v4625_v56 }
 0x402   :  { %v3887_v39 = vpop.eup %3886 }
 0x403   :  { %v2417_v10 = vmul.f32 %v3887_v39, %v3885_v52  ;;  %v4733_v52 = vld [vmem:[#allocation10 + $0x4c] ss:$16 sps:$4 sm:$0xff]   ;;  %v4736_v39 = vld [vmem:[#allocation10 + $0x40] ss:$16 sps:$4 sm:$0xff]  }
 0x405   :  { %v2418_v45 = vpack.c.bf16 %v2417_v10, %v2417_v10  ;;  %v4739_v10 = vld [vmem:[#allocation10 + $0x48] ss:$16 sps:$4 sm:$0xff]  }
 0x407   :  { %2456 = vmatmul.mubr.bf16.vlgmr.msra.gmra.mxu0 %v2418_v45  ;;  %2497 = vmatmul.mubr.bf16.vlgmr.msra.gmra.mxu1 %v2418_v45  ;;  %v4742_v45 = vld [vmem:[#allocation10 + $0x24] ss:$16 sps:$4 sm:$0xff]  }
 0x408   :  { %2539 = vmatpush1.bf16.msra.mxu0 %v4273_v15  ;;  %2580 = vmatpush1.bf16.msra.mxu1 %v4275_v58  ;;  %v4660_v15 = vld [vmem:[#allocation10 + $0xe4] ss:$16 sps:$4 sm:$0xff]   ;;  %v4663_v58 = vld [vmem:[#allocation10 + $0xec] ss:$16 sps:$4 sm:$0xff]  }
 0x409   :  { %2540 = vmatprep.subr.bf16.mxu0 %v4279_v59  ;;  %2581 = vmatprep.subr.bf16.mxu1 %v4281_v60 }
 0x40a   :  { %2570 = vmatprep.mubr.bf16.mxu0 %v4939_v11  ;;  %2611 = vmatprep.mubr.bf16.mxu1 %v4939_v11 }
 0x40c   :  { %2541 = vmatpush1.bf16.msra.mxu0 %v4287_v16  ;;  %2582 = vmatpush1.bf16.msra.mxu1 %v4289_v62  ;;  %v4956_v16 = vld [vmem:[#allocation34_spill] sm:$0xff] }
 0x40d   :  { %2542 = vmatprep.subr.bf16.mxu0 %v4293_v63  ;;  %2583 = vmatprep.subr.bf16.mxu1 %v4295_v49 }
 0x410   :  { %2543 = vmatpush1.bf16.msra.mxu0 %v4301_v5  ;;  %2584 = vmatpush1.bf16.msra.mxu1 %v4303_v30  ;;  %v4957_v30 = vld [vmem:[#allocation35_spill] sm:$0xff] }
 0x411   :  { %2544 = vmatprep.subr.bf16.mxu0 %v4307_v27  ;;  %2585 = vmatprep.subr.bf16.mxu1 %v4309_v1 }
 0x414   :  { %2545 = vmatpush1.bf16.msra.mxu0 %v4315_v17  ;;  %2586 = vmatpush1.bf16.msra.mxu1 %v4317_v36 }
 0x415   :  { %2546 = vmatprep.subr.bf16.mxu0 %v4321_v2  ;;  %2587 = vmatprep.subr.bf16.mxu1 %v4323_v3 }
 0x418   :  { %2547 = vmatpush1.bf16.msra.mxu0 %v4329_v21  ;;  %2588 = vmatpush1.bf16.msra.mxu1 %v4331_v44 }
 0x419   :  { %2548 = vmatprep.subr.bf16.mxu0 %v4335_v28  ;;  %2589 = vmatprep.subr.bf16.mxu1 %v4337_v6 }
 0x41c   :  { %2549 = vmatpush1.bf16.msra.mxu0 %v4940_v51  ;;  %2590 = vmatpush1.bf16.msra.mxu1 %v4941_v25 }
 0x41d   :  { %2550 = vmatprep.subr.bf16.mxu0 %v4942_v18  ;;  %2591 = vmatprep.subr.bf16.mxu1 %v4943_v57 }
 0x420   :  { %2551 = vmatpush1.bf16.msra.mxu0 %v4944_v12  ;;  %2592 = vmatpush1.bf16.msra.mxu1 %v4945_v40 }
 0x421   :  { %2552 = vmatprep.subr.bf16.mxu0 %v4946_v31  ;;  %2593 = vmatprep.subr.bf16.mxu1 %v4947_v0 }
 0x424   :  { %2553 = vmatpush1.bf16.msra.mxu0 %v4948_v61  ;;  %2594 = vmatpush1.bf16.msra.mxu1 %v4949_v24 }
 0x425   :  { %2653 = vmatprep.subr.bf16.mxu0 %v4660_v15  ;;  %2694 = vmatprep.subr.bf16.mxu1 %v4663_v58 }
 0x4c7   :  { %v2457_v59 = vpop.f32.mrf.mxu0  ;;  %v2498_v60 = vpop.f32.mrf.mxu1 }
 0x4c8   :  { %v2505_v62 = vadd.f32 %v2457_v59, %v4956_v16  ;;  %v2507_v21 = vadd.f32 %v2498_v60, %v4510_v26  ;;  %v4745_v59 = vld [vmem:[#allocation10 + $0x2c] ss:$16 sps:$4 sm:$0xff]   ;;  %v4748_v60 = vld [vmem:[#allocation10 + $0x20] ss:$16 sps:$4 sm:$0xff]   ;;  %v4751_v16 = vld [vmem:[#allocation10 + $0x28] ss:$16 sps:$4 sm:$0xff]  }
 0x4c9   :  { %v2459_v63 = vpop.f32.mrf.mxu0  ;;  %v2500_v49 = vpop.f32.mrf.mxu1 }
 0x4ca   :  { %v3384_v5 = vmul.f32 -1.442695, %v2505_v62  ;;  %v2506_v27 = vadd.f32 %v2459_v63, %v4957_v30  ;;  %v3386_v44 = vmul.f32 -1.442695, %v2507_v21  ;;  %v2508_v28 = vadd.f32 %v2500_v49, %v4512_v46  ;;  %v4754_v62 = vld [vmem:[#allocation10 + $0x4] ss:$16 sps:$4 sm:$0xff]  }
 0x4cb   :  { %v2461_v1 = vpop.f32.mrf.mxu0  ;;  %v2502_v17 = vpop.f32.mrf.mxu1  ;;  %v4757_v63 = vld [vmem:[#allocation10 + $0xc] ss:$16 sps:$4 sm:$0xff]   ;;  %v4760_v49 = vld [vmem:[#allocation10] ss:$16 sps:$4 sm:$0xff]  }
 0x4cc   :  { %3888 = vpow2.f32 %v3384_v5  ;;  %v3385_v36 = vmul.f32 -1.442695, %v2506_v27  ;;  %v4763_v5 = vld [vmem:[#allocation10 + $0x8] ss:$16 sps:$4 sm:$0xff]   ;;  %v4959_v21 = vld [vmem:[#allocation37_spill] sm:$0xff] }
 0x4cd   :  { %v2462_v2 = vpop.f32.mrf.mxu0  ;;  %v2503_v3 = vpop.f32.mrf.mxu1  ;;  %v4958_v1 = vld [vmem:[#allocation36_spill] sm:$0xff] }
 0x4ce   :  { %3890 = vpow2.f32 %v3385_v36 }
 0x4cf   :  { %3892 = vpow2.f32 %v3386_v44 }
 0x4d0   :  { %3894 = vtanh.f32 %v2508_v28 }
 0x4d9   :  { %v3889_v6 = vpop.eup %3888 }
 0x4da   :  { %v2518_v51 = vadd.f32 1.0, %v3889_v6 }
 0x4db   :  { %v3891_v25 = vpop.eup %3890 }
 0x4dc   :  { %3896 = vrcp.f32 %v2518_v51  ;;  %v2519_v18 = vadd.f32 1.0, %v3891_v25  ;;  %v3893_v57 = vpop.eup %3892 }
 0x4dd   :  { %v3895_v12 = vpop.eup %3894  ;;  %v2520_v61 = vadd.f32 1.0, %v3893_v57 }
 0x4de   :  { %3898 = vrcp.f32 %v2519_v18 }
 0x4df   :  { %3900 = vrcp.f32 %v2520_v61 }
 0x4e9   :  { %v3897_v40 = vpop.eup %3896 }
 0x4ea   :  { %v2529_v31 = vmul.f32 %v3897_v40, %v3895_v12 }
 0x4eb   :  { %v3899_v0 = vpop.eup %3898 }
 0x4ec   :  { %v2528_v24 = vmul.f32 %v3899_v0, %v4625_v56  ;;  %v3901_v46 = vpop.eup %3900  ;;  %v4730_v56 = vld [vmem:[#allocation10 + $0x44] ss:$16 sps:$4 sm:$0xff]  }
 0x4ee   :  { %v4671_v26 = vadd.f32 %v2529_v31, %v2528_v24 }
 0x4f0   :  { %3902 = vtanh.f32 %v4671_v26 }
 0x4fd   :  { %v3903_v55 = vpop.eup %3902 }
 0x4fe   :  { %v2532_v9 = vmul.f32 %v3903_v55, %v3901_v46 }
 0x500   :  { %v2533_v34 = vpack.c.bf16 %v2532_v9, %v2532_v9 }
 0x502   :  { %2571 = vmatmul.mubr.bf16.vlgmr.msra.gmra.mxu0 %v2533_v34  ;;  %2612 = vmatmul.mubr.bf16.vlgmr.msra.gmra.mxu1 %v2533_v34 }
 0x503   :  { %2654 = vmatpush1.bf16.msra.mxu0 %v4674_v32  ;;  %2695 = vmatpush1.bf16.msra.mxu1 %v4677_v8 }
 0x504   :  { %2655 = vmatprep.subr.bf16.mxu0 %v4680_v4  ;;  %2696 = vmatprep.subr.bf16.mxu1 %v4683_v13 }
 0x505   :  { %2685 = vmatprep.mubr.bf16.mxu0 %v4939_v11  ;;  %2726 = vmatprep.mubr.bf16.mxu1 %v4939_v11 }
 0x507   :  { %2656 = vmatpush1.bf16.msra.mxu0 %v4688_v53  ;;  %2697 = vmatpush1.bf16.msra.mxu1 %v4691_v41 }
 0x508   :  { %2657 = vmatprep.subr.bf16.mxu0 %v4694_v54  ;;  %2698 = vmatprep.subr.bf16.mxu1 %v4697_v35 }
 0x50b   :  { %2658 = vmatpush1.bf16.msra.mxu0 %v4700_v47  ;;  %2699 = vmatpush1.bf16.msra.mxu1 %v4703_v23 }
 0x50c   :  { %2659 = vmatprep.subr.bf16.mxu0 %v4706_v22  ;;  %2700 = vmatprep.subr.bf16.mxu1 %v4709_v37 }
 0x50f   :  { %2660 = vmatpush1.bf16.msra.mxu0 %v4712_v42  ;;  %2701 = vmatpush1.bf16.msra.mxu1 %v4715_v50 }
 0x510   :  { %2661 = vmatprep.subr.bf16.mxu0 %v4718_v43  ;;  %2702 = vmatprep.subr.bf16.mxu1 %v4721_v20 }
 0x513   :  { %2662 = vmatpush1.bf16.msra.mxu0 %v4724_v48  ;;  %2703 = vmatpush1.bf16.msra.mxu1 %v4727_v38 }
 0x514   :  { %2663 = vmatprep.subr.bf16.mxu0 %v4730_v56  ;;  %2704 = vmatprep.subr.bf16.mxu1 %v4733_v52 }
 0x517   :  { %2664 = vmatpush1.bf16.msra.mxu0 %v4736_v39  ;;  %2705 = vmatpush1.bf16.msra.mxu1 %v4739_v10 }
 0x518   :  { %2665 = vmatprep.subr.bf16.mxu0 %v4742_v45  ;;  %2706 = vmatprep.subr.bf16.mxu1 %v4745_v59 }
 0x51b   :  { %2666 = vmatpush1.bf16.msra.mxu0 %v4748_v60  ;;  %2707 = vmatpush1.bf16.msra.mxu1 %v4751_v16 }
 0x51c   :  { %2667 = vmatprep.subr.bf16.mxu0 %v4754_v62  ;;  %2708 = vmatprep.subr.bf16.mxu1 %v4757_v63 }
 0x51f   :  { %2668 = vmatpush1.bf16.msra.mxu0 %v4760_v49  ;;  %2709 = vmatpush1.bf16.msra.mxu1 %v4763_v5 }
 0x520   :  { %2768 = vmatprep.subr.bf16.mxu0 %v4660_v15  ;;  %2809 = vmatprep.subr.bf16.mxu1 %v4663_v58 }
 0x5c2   :  { %v2572_v30 = vpop.f32.mrf.mxu0  ;;  %v2613_v27 = vpop.f32.mrf.mxu1 }
 0x5c3   :  { %v2620_v17 = vadd.f32 %v2572_v30, %v4958_v1  ;;  %v2622_v57 = vadd.f32 %v2613_v27, %v4514_v19 }
 0x5c4   :  { %v2574_v36 = vpop.f32.mrf.mxu0  ;;  %v2615_v2 = vpop.f32.mrf.mxu1 }
 0x5c5   :  { %v3387_v3 = vmul.f32 -1.442695, %v2620_v17  ;;  %v2621_v44 = vadd.f32 %v2574_v36, %v4959_v21  ;;  %v3389_v12 = vmul.f32 -1.442695, %v2622_v57  ;;  %v2623_v40 = vadd.f32 %v2615_v2, %v4516_v33  ;;  %v4960_v21 = vld [vmem:[#allocation38_spill] sm:$0xff] }
 0x5c6   :  { %v2576_v28 = vpop.f32.mrf.mxu0  ;;  %v2617_v6 = vpop.f32.mrf.mxu1 }
 0x5c7   :  { %3904 = vpow2.f32 %v3387_v3  ;;  %v3388_v51 = vmul.f32 -1.442695, %v2621_v44 }
 0x5c8   :  { %v2577_v25 = vpop.f32.mrf.mxu0  ;;  %v2618_v18 = vpop.f32.mrf.mxu1 }
 0x5c9   :  { %3906 = vpow2.f32 %v3388_v51  ;;  %v4961_v25 = vld [vmem:[#allocation39_spill] sm:$0xff] }
 0x5ca   :  { %3908 = vpow2.f32 %v3389_v12 }
 0x5cb   :  { %3910 = vtanh.f32 %v2623_v40 }
 0x5d4   :  { %v3905_v31 = vpop.eup %3904 }
 0x5d5   :  { %v2633_v0 = vadd.f32 1.0, %v3905_v31 }
 0x5d6   :  { %v3907_v61 = vpop.eup %3906 }
 0x5d7   :  { %3912 = vrcp.f32 %v2633_v0  ;;  %v2634_v24 = vadd.f32 1.0, %v3907_v61  ;;  %v3909_v46 = vpop.eup %3908 }
 0x5d8   :  { %v3911_v55 = vpop.eup %3910  ;;  %v2635_v1 = vadd.f32 1.0, %v3909_v46 }
 0x5d9   :  { %3914 = vrcp.f32 %v2634_v24 }
 0x5da   :  { %3916 = vrcp.f32 %v2635_v1 }
 0x5e4   :  { %v3913_v9 = vpop.eup %3912 }
 0x5e5   :  { %v2644_v34 = vmul.f32 %v3913_v9, %v3911_v55 }
 0x5e6   :  { %v3915_v30 = vpop.eup %3914 }
 0x5e7   :  { %v2643_v17 = vmul.f32 %v3915_v30, %v4671_v26  ;;  %v3917_v33 = vpop.eup %3916 }
 0x5e9   :  { %v4773_v19 = vadd.f32 %v2644_v34, %v2643_v17 }
 0x5eb   :  { %3918 = vtanh.f32 %v4773_v19 }
 0x5f8   :  { %v3919_v27 = vpop.eup %3918 }
 0x5f9   :  { %v2647_v36 = vmul.f32 %v3919_v27, %v3917_v33 }
 0x5fb   :  { %v2648_v2 = vpack.c.bf16 %v2647_v36, %v2647_v36 }
 0x5fd   :  { %2686 = vmatmul.mubr.bf16.vlgmr.msra.gmra.mxu0 %v2648_v2  ;;  %2727 = vmatmul.mubr.bf16.vlgmr.msra.gmra.mxu1 %v2648_v2 }
 0x5fe   :  { %2769 = vmatpush1.bf16.msra.mxu0 %v4674_v32  ;;  %2810 = vmatpush1.bf16.msra.mxu1 %v4677_v8 }
 0x5ff   :  { %2770 = vmatprep.subr.bf16.mxu0 %v4680_v4  ;;  %2811 = vmatprep.subr.bf16.mxu1 %v4683_v13 }
 0x600   :  { %2800 = vmatprep.mubr.bf16.mxu0 %v4939_v11  ;;  %2841 = vmatprep.mubr.bf16.mxu1 %v4939_v11 }
 0x602   :  { %2771 = vmatpush1.bf16.msra.mxu0 %v4688_v53  ;;  %2812 = vmatpush1.bf16.msra.mxu1 %v4691_v41 }
 0x603   :  { %2772 = vmatprep.subr.bf16.mxu0 %v4694_v54  ;;  %2813 = vmatprep.subr.bf16.mxu1 %v4697_v35 }
 0x606   :  { %2773 = vmatpush1.bf16.msra.mxu0 %v4700_v47  ;;  %2814 = vmatpush1.bf16.msra.mxu1 %v4703_v23 }
 0x607   :  { %2774 = vmatprep.subr.bf16.mxu0 %v4706_v22  ;;  %2815 = vmatprep.subr.bf16.mxu1 %v4709_v37 }
 0x60a   :  { %2775 = vmatpush1.bf16.msra.mxu0 %v4712_v42  ;;  %2816 = vmatpush1.bf16.msra.mxu1 %v4715_v50 }
 0x60b   :  { %2776 = vmatprep.subr.bf16.mxu0 %v4718_v43  ;;  %2817 = vmatprep.subr.bf16.mxu1 %v4721_v20 }
 0x60e   :  { %2777 = vmatpush1.bf16.msra.mxu0 %v4724_v48  ;;  %2818 = vmatpush1.bf16.msra.mxu1 %v4727_v38 }
 0x60f   :  { %2778 = vmatprep.subr.bf16.mxu0 %v4730_v56  ;;  %2819 = vmatprep.subr.bf16.mxu1 %v4733_v52 }
 0x612   :  { %2779 = vmatpush1.bf16.msra.mxu0 %v4736_v39  ;;  %2820 = vmatpush1.bf16.msra.mxu1 %v4739_v10 }
 0x613   :  { %2780 = vmatprep.subr.bf16.mxu0 %v4742_v45  ;;  %2821 = vmatprep.subr.bf16.mxu1 %v4745_v59 }
 0x616   :  { %2781 = vmatpush1.bf16.msra.mxu0 %v4748_v60  ;;  %2822 = vmatpush1.bf16.msra.mxu1 %v4751_v16 }
 0x617   :  { %2782 = vmatprep.subr.bf16.mxu0 %v4754_v62  ;;  %2823 = vmatprep.subr.bf16.mxu1 %v4757_v63 }
 0x61a   :  { %2783 = vmatpush1.bf16.msra.mxu0 %v4760_v49  ;;  %2824 = vmatpush1.bf16.msra.mxu1 %v4763_v5 }
 0x61b   :  { %2883 = vmatprep.subr.bf16.mxu0 %v4660_v15  ;;  %2924 = vmatprep.subr.bf16.mxu1 %v4663_v58 }
 0x6bd   :  { %v2687_v26 = vpop.f32.mrf.mxu0  ;;  %v2728_v3 = vpop.f32.mrf.mxu1 }
 0x6be   :  { %v2735_v44 = vadd.f32 %v2687_v26, %v4960_v21  ;;  %v2737_v15 = vadd.f32 %v2728_v3, %v4518_v7 }
 0x6bf   :  { %v2689_v28 = vpop.f32.mrf.mxu0  ;;  %v2730_v6 = vpop.f32.mrf.mxu1 }
 0x6c0   :  { %v3390_v51 = vmul.f32 -1.442695, %v2735_v44  ;;  %v2736_v18 = vadd.f32 %v2689_v28, %v4961_v25  ;;  %v3392_v61 = vmul.f32 -1.442695, %v2737_v15  ;;  %v2738_v58 = vadd.f32 %v2730_v6, %v4520_v29  ;;  %v3016_v28 = vld [vmem:[#allocation11 + $0x78] sm:$0xff]  ;;  %v3015_v6 = vld [vmem:[#allocation11 + $0x70] sm:$0xff] }
 0x6c1   :  { %v2691_v57 = vpop.f32.mrf.mxu0  ;;  %v2732_v12 = vpop.f32.mrf.mxu1  ;;  %v4119_v44 = vmov 0.0   ;;  %v3013_v25 = vld [vmem:[#allocation11 + $0x60] sm:$0xff]  ;;  %v3006_v15 = vld [vmem:[#allocation11 + $0x28] sm:$0xff] }
 0x6c2   :  { %3920 = vpow2.f32 %v3390_v51  ;;  %v3391_v40 = vmul.f32 -1.442695, %v2736_v18  ;;  %v3014_v51 = vld [vmem:[#allocation11 + $0x68] sm:$0xff]  ;;  %v3012_v18 = vld [vmem:[#allocation11 + $0x58] sm:$0xff]  ;;  %v3011_v57 = vld [vmem:[#allocation11 + $0x50] sm:$0xff] }
 0x6c3   :  { %v2692_v31 = vpop.f32.mrf.mxu0  ;;  %v2733_v0 = vpop.f32.mrf.mxu1  ;;  %v3010_v12 = vld [vmem:[#allocation11 + $0x48] sm:$0xff] }
 0x6c4   :  { %3922 = vpow2.f32 %v3391_v40  ;;  %v3009_v40 = vld [vmem:[#allocation11 + $0x40] sm:$0xff]  ;;  %v3008_v31 = vld [vmem:[#allocation11 + $0x38] sm:$0xff]  ;;  %v3007_v0 = vld [vmem:[#allocation11 + $0x30] sm:$0xff] }
 0x6c5   :  { %3924 = vpow2.f32 %v3392_v61  ;;  %v3005_v61 = vld [vmem:[#allocation11 + $0x20] sm:$0xff] }
 0x6c6   :  { %3926 = vtanh.f32 %v2738_v58  ;;  %v3004_v58 = vld [vmem:[#allocation11 + $0x18] sm:$0xff] }
 0x6cf   :  { %v3921_v24 = vpop.eup %3920 }
 0x6d0   :  { %v2748_v46 = vadd.f32 1.0, %v3921_v24  ;;  %v3003_v24 = vld [vmem:[#allocation11 + $0x10] sm:$0xff] }
 0x6d1   :  { %v3923_v55 = vpop.eup %3922 }
 0x6d2   :  { %3928 = vrcp.f32 %v2748_v46  ;;  %v2749_v9 = vadd.f32 1.0, %v3923_v55  ;;  %v3925_v34 = vpop.eup %3924  ;;  %v3002_v46 = vld [vmem:[#allocation11 + $0x8] sm:$0xff]  ;;  %v3001_v55 = vld [vmem:[#allocation11] sm:$0xff] }
 0x6d3   :  { %v3927_v30 = vpop.eup %3926  ;;  %v2750_v27 = vadd.f32 1.0, %v3925_v34 }
 0x6d4   :  { %3930 = vrcp.f32 %v2749_v9  ;;  %v3017_v9 = vld [vmem:[%s4879_s4] sm:$0xff] }
 0x6d5   :  { %3932 = vrcp.f32 %v2750_v27  ;;  %3021 = vperm.xlu0 %3467, %v3017_v9  }
 0x6df   :  { %v3929_v1 = vpop.eup %3928 }
 0x6e0   :  { %v2759_v17 = vmul.f32 %v3929_v1, %v3927_v30  ;;  %v4965_v1 = vld [vmem:[#allocation42_spill] sm:$0xff] }
 0x6e1   :  { %v3931_v33 = vpop.eup %3930 }
 0x6e2   :  { %v2758_v36 = vmul.f32 %v3931_v33, %v4773_v19  ;;  %v3933_v29 = vpop.eup %3932 }
 0x6e4   :  { %v4815_v7 = vadd.f32 %v2759_v17, %v2758_v36 }
 0x6e6   :  { %3934 = vtanh.f32 %v4815_v7 }
 0x6f3   :  { %v3935_v2 = vpop.eup %3934 }
 0x6f4   :  { %v2762_v26 = vmul.f32 %v3935_v2, %v3933_v29 }
 0x6f6   :  { %v2763_v3 = vpack.c.bf16 %v2762_v26, %v2762_v26 }
 0x6f8   :  { %2801 = vmatmul.mubr.bf16.vlgmr.msra.gmra.mxu0 %v2763_v3  ;;  %2842 = vmatmul.mubr.bf16.vlgmr.msra.gmra.mxu1 %v2763_v3 }
 0x6f9   :  { %2884 = vmatpush1.bf16.msra.mxu0 %v4674_v32  ;;  %2925 = vmatpush1.bf16.msra.mxu1 %v4677_v8  ;;  %v4962_v8 = vld [vmem:[#allocation40_spill] sm:$0xff] }
 0x6fa   :  { %2885 = vmatprep.subr.bf16.mxu0 %v4680_v4  ;;  %2926 = vmatprep.subr.bf16.mxu1 %v4683_v13 }
 0x6fb   :  { %2915 = vmatprep.mubr.bf16.mxu0 %v4939_v11  ;;  %2956 = vmatprep.mubr.bf16.mxu1 %v4939_v11 }
 0x6fd   :  { %2886 = vmatpush1.bf16.msra.mxu0 %v4688_v53  ;;  %2927 = vmatpush1.bf16.msra.mxu1 %v4691_v41 }
 0x6fe   :  { %2887 = vmatprep.subr.bf16.mxu0 %v4694_v54  ;;  %2928 = vmatprep.subr.bf16.mxu1 %v4697_v35  ;;  %v4963_v54 = vld [vmem:[#allocation41_spill] sm:$0xff] }
 0x701   :  { %2888 = vmatpush1.bf16.msra.mxu0 %v4700_v47  ;;  %2929 = vmatpush1.bf16.msra.mxu1 %v4703_v23 }
 0x702   :  { %2889 = vmatprep.subr.bf16.mxu0 %v4706_v22  ;;  %2930 = vmatprep.subr.bf16.mxu1 %v4709_v37 }
 0x705   :  { %2890 = vmatpush1.bf16.msra.mxu0 %v4712_v42  ;;  %2931 = vmatpush1.bf16.msra.mxu1 %v4715_v50 }
 0x706   :  { %2891 = vmatprep.subr.bf16.mxu0 %v4718_v43  ;;  %2932 = vmatprep.subr.bf16.mxu1 %v4721_v20  ;;  %v4964_v20 = vld [vmem:[#allocation44_spill] sm:$0xff] }
 0x709   :  { %2892 = vmatpush1.bf16.msra.mxu0 %v4724_v48  ;;  %2933 = vmatpush1.bf16.msra.mxu1 %v4727_v38 }
 0x70a   :  { %2893 = vmatprep.subr.bf16.mxu0 %v4730_v56  ;;  %2934 = vmatprep.subr.bf16.mxu1 %v4733_v52 }
 0x70d   :  { %2894 = vmatpush1.bf16.msra.mxu0 %v4736_v39  ;;  %2935 = vmatpush1.bf16.msra.mxu1 %v4739_v10 }
 0x70e   :  { %2895 = vmatprep.subr.bf16.mxu0 %v4742_v45  ;;  %2936 = vmatprep.subr.bf16.mxu1 %v4745_v59 }
 0x711   :  { %2896 = vmatpush1.bf16.msra.mxu0 %v4748_v60  ;;  %2937 = vmatpush1.bf16.msra.mxu1 %v4751_v16 }
 0x712   :  { %2897 = vmatprep.subr.bf16.mxu0 %v4754_v62  ;;  %2938 = vmatprep.subr.bf16.mxu1 %v4757_v63 }
 0x715   :  { %2898 = vmatpush1.bf16.msra.mxu0 %v4760_v49  ;;  %2939 = vmatpush1.bf16.msra.mxu1 %v4763_v5 }
 0x716   :  { %3418 = vmatprep.subr.mxu0 %v4119_v44 }
 0x7b8   :  { %v2802_v11 = vpop.f32.mrf.mxu0  ;;  %v2843_v32 = vpop.f32.mrf.mxu1 }
 0x7b9   :  { %v2850_v4 = vadd.f32 %v2802_v11, %v4962_v8  ;;  %v2852_v50 = vadd.f32 %v2843_v32, %v4522_v14  ;;  %v4967_v8 = vld [vmem:[#allocation45_spill] sm:$0xff] }
 0x7ba   :  { %v2804_v13 = vpop.f32.mrf.mxu0  ;;  %v2845_v53 = vpop.f32.mrf.mxu1 }
 0x7bb   :  { %v3393_v41 = vmul.f32 -1.442695, %v2850_v4  ;;  %v2851_v35 = vadd.f32 %v2804_v13, %v4963_v54  ;;  %v3395_v43 = vmul.f32 -1.442695, %v2852_v50  ;;  %v2853_v48 = vadd.f32 %v2845_v53, %v4964_v20  ;;  %v4968_v53 = vld [vmem:[#allocation46_spill] sm:$0xff] }
 0x7bc   :  { %v2806_v47 = vpop.f32.mrf.mxu0  ;;  %v2847_v23 = vpop.f32.mrf.mxu1 }
 0x7bd   :  { %3936 = vpow2.f32 %v3393_v41  ;;  %v3394_v22 = vmul.f32 -1.442695, %v2851_v35 }
 0x7be   :  { %v2807_v37 = vpop.f32.mrf.mxu0  ;;  %v2848_v42 = vpop.f32.mrf.mxu1 }
 0x7bf   :  { %3938 = vpow2.f32 %v3394_v22 }
 0x7c0   :  { %3940 = vpow2.f32 %v3395_v43 }
 0x7c1   :  { %3942 = vtanh.f32 %v2853_v48 }
 0x7ca   :  { %v3937_v38 = vpop.eup %3936 }
 0x7cb   :  { %v2863_v56 = vadd.f32 1.0, %v3937_v38 }
 0x7cc   :  { %v3939_v52 = vpop.eup %3938 }
 0x7cd   :  { %3944 = vrcp.f32 %v2863_v56  ;;  %v2864_v39 = vadd.f32 1.0, %v3939_v52  ;;  %v3941_v10 = vpop.eup %3940 }
 0x7ce   :  { %v3943_v45 = vpop.eup %3942  ;;  %v2865_v62 = vadd.f32 1.0, %v3941_v10 }
 0x7cf   :  { %3946 = vrcp.f32 %v2864_v39 }
 0x7d0   :  { %3948 = vrcp.f32 %v2865_v62 }
 0x7da   :  { %v3945_v59 = vpop.eup %3944 }
 0x7db   :  { %v2874_v60 = vmul.f32 %v3945_v59, %v3943_v45 }
 0x7dc   :  { %v3947_v16 = vpop.eup %3946 }
 0x7dd   :  { %v2873_v63 = vmul.f32 %v3947_v16, %v4815_v7  ;;  %v3949_v49 = vpop.eup %3948  ;;  %v4966_v7 = vld [vmem:[#allocation43_spill] sm:$0xff]  ;;  %v3022_v16 = vpop.permute.xlu0 %3021 }
 0x7df   :  { %v4855_v14 = vadd.f32 %v2874_v60, %v2873_v63  ;;  %v3399_v60 = vld [vmem:[%s4881_s6] ss:$0 sm:$0xff] }
 0x7e0   :  { %v3030_v62 = vmul.f32 %v3399_v60, %v3022_v16 }
 0x7e1   :  { %3950 = vtanh.f32 %v4855_v14 }
 0x7ee   :  { %v3951_v5 = vpop.eup %3950 }
 0x7ef   :  { %v2877_v19 = vmul.f32 %v3951_v5, %v3949_v49 }
 0x7f1   :  { %v2878_v21 = vpack.c.bf16 %v2877_v19, %v2877_v19 }
 0x7f3   :  { %2916 = vmatmul.mubr.bf16.vlgmr.msra.gmra.mxu0 %v2878_v21  ;;  %2957 = vmatmul.mubr.bf16.vlgmr.msra.gmra.mxu1 %v2878_v21 }
 0x7f4   :  { %3419 = vmatpush3.msra.mxu0 %v3016_v28  ;;  %3450 = vmatprep.mubr.msk.f32.mxu0 %vm4120_vm0, %v4119_v44 }
 0x7f5   :  { %3420 = vmatprep.subr.mxu0 %v4119_v44 }
 0x7f6   :  { %3421 = vmatpush3.msra.mxu0 %v3015_v6 }
 0x7f7   :  { %3422 = vmatprep.subr.mxu0 %v4119_v44 }
 0x7f8   :  { %3423 = vmatpush3.msra.mxu0 %v3014_v51 }
 0x7f9   :  { %3424 = vmatprep.subr.mxu0 %v4119_v44 }
 0x7fa   :  { %3425 = vmatpush3.msra.mxu0 %v3013_v25 }
 0x7fb   :  { %3426 = vmatprep.subr.mxu0 %v4119_v44 }
 0x7fc   :  { %3427 = vmatpush3.msra.mxu0 %v3012_v18 }
 0x7fd   :  { %3428 = vmatprep.subr.mxu0 %v4119_v44 }
 0x7fe   :  { %3429 = vmatpush3.msra.mxu0 %v3011_v57 }
 0x7ff   :  { %3430 = vmatprep.subr.mxu0 %v4119_v44 }
 0x800   :  { %3431 = vmatpush3.msra.mxu0 %v3010_v12 }
 0x801   :  { %3432 = vmatprep.subr.mxu0 %v4119_v44 }
 0x802   :  { %3433 = vmatpush3.msra.mxu0 %v3009_v40 }
 0x803   :  { %3434 = vmatprep.subr.mxu0 %v4119_v44 }
 0x804   :  { %3435 = vmatpush3.msra.mxu0 %v3008_v31 }
 0x805   :  { %3436 = vmatprep.subr.mxu0 %v4119_v44 }
 0x806   :  { %3437 = vmatpush3.msra.mxu0 %v3007_v0 }
 0x807   :  { %3438 = vmatprep.subr.mxu0 %v4119_v44 }
 0x808   :  { %3439 = vmatpush3.msra.mxu0 %v3006_v15 }
 0x809   :  { %3440 = vmatprep.subr.mxu0 %v4119_v44 }
 0x80a   :  { %3441 = vmatpush3.msra.mxu0 %v3005_v61 }
 0x80b   :  { %3442 = vmatprep.subr.mxu0 %v4119_v44 }
 0x80c   :  { %3443 = vmatpush3.msra.mxu0 %v3004_v58 }
 0x80d   :  { %3444 = vmatprep.subr.mxu0 %v4119_v44 }
 0x80e   :  { %3445 = vmatpush3.msra.mxu0 %v3003_v24 }
 0x80f   :  { %3446 = vmatprep.subr.mxu0 %v4119_v44 }
 0x810   :  { %3447 = vmatpush3.msra.mxu0 %v3002_v46 }
 0x811   :  { %3448 = vmatprep.subr.mxu0 %v4119_v44 }
 0x812   :  { %3449 = vmatpush3.msra.mxu0 %v3001_v55 }
 0x8b3   :  { %v2917_v34 = vpop.f32.mrf.mxu0  ;;  %v2958_v30 = vpop.f32.mrf.mxu1 }
 0x8b4   :  { %v2965_v17 = vadd.f32 %v2917_v34, %v4965_v1  ;;  %v2967_v4 = vadd.f32 %v2958_v30, %v4967_v8 }
 0x8b5   :  { %v2919_v33 = vpop.f32.mrf.mxu0  ;;  %v2960_v27 = vpop.f32.mrf.mxu1 }
 0x8b6   :  { %v3396_v36 = vmul.f32 -1.442695, %v2965_v17  ;;  %v2966_v29 = vadd.f32 %v2919_v33, %v4966_v7  ;;  %v3398_v13 = vmul.f32 -1.442695, %v2967_v4  ;;  %v2968_v41 = vadd.f32 %v2960_v27, %v4968_v53 }
 0x8b7   :  { %v2921_v2 = vpop.f32.mrf.mxu0  ;;  %v2962_v26 = vpop.f32.mrf.mxu1 }
 0x8b8   :  { %3952 = vpow2.f32 %v3396_v36  ;;  %v3397_v3 = vmul.f32 -1.442695, %v2966_v29 }
 0x8b9   :  { %v2922_v11 = vpop.f32.mrf.mxu0  ;;  %v2963_v32 = vpop.f32.mrf.mxu1 }
 0x8ba   :  { %3954 = vpow2.f32 %v3397_v3 }
 0x8bb   :  { %3956 = vpow2.f32 %v3398_v13 }
 0x8bc   :  { %3958 = vtanh.f32 %v2968_v41 }
 0x8c5   :  { %v3953_v54 = vpop.eup %3952 }
 0x8c6   :  { %v2978_v35 = vadd.f32 1.0, %v3953_v54 }
 0x8c7   :  { %v3955_v47 = vpop.eup %3954 }
 0x8c8   :  { %3960 = vrcp.f32 %v2978_v35  ;;  %v2979_v23 = vadd.f32 1.0, %v3955_v47  ;;  %v3957_v22 = vpop.eup %3956 }
 0x8c9   :  { %v3959_v37 = vpop.eup %3958  ;;  %v2980_v20 = vadd.f32 1.0, %v3957_v22 }
 0x8ca   :  { %3962 = vrcp.f32 %v2979_v23 }
 0x8cb   :  { %3964 = vrcp.f32 %v2980_v20 }
 0x8d5   :  { %v3961_v42 = vpop.eup %3960 }
 0x8d6   :  { %v2989_v50 = vmul.f32 %v3961_v42, %v3959_v37 }
 0x8d7   :  { %v3963_v43 = vpop.eup %3962 }
 0x8d8   :  { %v2988_v48 = vmul.f32 %v3963_v43, %v4855_v14  ;;  %v3965_v56 = vpop.eup %3964  ;;  %v3400_v14 = vld [vmem:[%s4882_s7] ss:$0 sm:$0xff] }
 0x8da   :  { %v2990_v38 = vadd.f32 %v2989_v50, %v2988_v48 }
 0x8dc   :  { %3966 = vtanh.f32 %v2990_v38 }
 0x8e9   :  { %v3967_v52 = vpop.eup %3966 }
 0x8ea   :  { %v2992_v39 = vmul.f32 %v3967_v52, %v3965_v56 }
 0x8ec   :  { %v2993_v10 = vpack.c.bf16 %v2992_v39, %v2992_v39 }
 0x8ee   :  { %2994 = vst [vmem:[#allocation3] sm:$0xf] %v2993_v10 }
 0x8f5   :  { %v2999_v45 = vld [vmem:[#allocation3] sm:$0xf] }
 0x8f6   :  { %v3000_v59 = vunpack.c.l.bf16 %v2999_v45 }
 0x8f8   :  { %3451 = vmatmul.mubr.f32.vlgmr.msra.gmra.mxu0 %v3000_v59 }
 0x9b8   :  { %v3097_v63 = vpop.f32.mrf.mxu0 }
 0x9b9   :  { %v3098_v49 = vadd.f32 %v3097_v63, %v3030_v62 }
 0x9ba   :  { %v3452_v5 = vpop.f32.mrf.mxu0 }
 0x9bb   :  { %v3108_v19 = vadd.f32 %v3400_v14, %v3098_v49 }
 0x9bd   :  { %3109 = vst [vmem:[#allocation13] sm:$0xff] %v3108_v19 }
 0x9be   :  { %4091 = shalt.err (!%p4088_p10)
}
 0x9bf   :  { %3119 = dma.vmem_to_hbm [thread:$0]  %s3117_s12, 128, %s4883_s8, [#allocation7]  }
 0x9c0   :  { %4106 = dma.done.wait [#allocation7], 128  }
 0x9c1   :  { %4107 = vsyncadd [#allocation7], 4294967168 }
 0x9c2   :  { %3123 = vsyncpa [#allocation6], 1 }
 0x9c3   :  { %3124 = vsyncpa [#allocation9], 1 }
 0x9c4   :  { %3125 = vsyncpa [#allocation12], 1 }
 0x9c5   :  { %3126 = vsyncpa [#allocation7], 1 }

</bundles_post_ra>
